<compile_context>
chip_gen: v7x
topology: tpu7x:2x2x1
jax: 0.10.0
libtpu: 0.0.40
codegen_flags: <defaults>
</compile_context>

<pallas_src>
import math

import jax
import jax.numpy as jnp
from jax import lax
from jax.experimental import pallas as pl
from jax.experimental.pallas import tpu as pltpu

# ----------------------------- configuration -----------------------------
HIDDEN = 32
NUM_HEADS = 4
EXPAND_K = 1.0
EXPAND_V = 2.0
KEY_DIM = int(HIDDEN * EXPAND_K)        # 32
VALUE_DIM = int(HIDDEN * EXPAND_V)      # 64
HEAD_QK = KEY_DIM // NUM_HEADS          # 8
HEAD_V = VALUE_DIM // NUM_HEADS         # 16
GATE_LOW_RANK = 16
GATE_LOGIT_NORMALIZER = 16.0
EPS = 1e-5
CHUNK = 64                              # fused_chunk chunk length


# ----------------------------- fused Pallas kernel -----------------------------
def _gla_fused_kernel(x_ref, wq_ref, wk_ref, wv_ref, wg_ref, wgk1_ref, wgk2_ref,
                      bgk2_ref, wo_ref, gnw_ref, out_ref):
    """Whole GLA forward for one batch element, fully resident in VMEM.

    x_ref   : (L, HIDDEN)
    wq/wk   : (H, HIDDEN, dk)     wv/wg : (H, HIDDEN, dv)
    wgk1    : (HIDDEN, R)         wgk2  : (H, R, dk)     bgk2 : (H, 1, dk)
    wo      : (H, dv, HIDDEN)     gnw   : (1, 1, dv)
    out_ref : (L, HIDDEN)
    """
    L, hidden = x_ref.shape
    H, _, dk = wq_ref.shape
    dv = wv_ref.shape[-1]
    scale = dk ** -0.5

    # ---- fused projections (batched over heads; all MXU work) ----
    x = x_ref[...]                                           # (L, hidden)
    xh = jnp.broadcast_to(x[None], (H, L, hidden))
    q = jnp.einsum("hlc,hck->hlk", xh, wq_ref[...], preferred_element_type=jnp.float32)
    k = jnp.einsum("hlc,hck->hlk", xh, wk_ref[...], preferred_element_type=jnp.float32)
    v = jnp.einsum("hlc,hcv->hlv", xh, wv_ref[...], preferred_element_type=jnp.float32)
    g = jnp.einsum("hlc,hcv->hlv", xh, wg_ref[...], preferred_element_type=jnp.float32)

    gk_low = jnp.dot(x, wgk1_ref[...], preferred_element_type=jnp.float32)     # (L, R)
    gk_low_h = jnp.broadcast_to(gk_low[None], (H, L, gk_low.shape[-1]))
    gk = (jnp.einsum("hlr,hrk->hlk", gk_low_h, wgk2_ref[...],
                     preferred_element_type=jnp.float32) + bgk2_ref[...])      # (H, L, dk)

    # ---- gate: normalized log-sigmoid, one vectorized pass (hoisted out of loops) ----
    log_decay = (jnp.minimum(gk, 0.0)
                 - jnp.log(1.0 + jnp.exp(-jnp.abs(gk)))) / GATE_LOGIT_NORMALIZER

    # ---- fused_chunk recurrence ----
    C = min(L, CHUNK)
    n_chunks = L // C

    row = lax.broadcasted_iota(jnp.int32, (C, C), 0)
    col = lax.broadcasted_iota(jnp.int32, (C, C), 1)
    incl_tri = (col <= row).astype(jnp.float32)              # lower-tri incl. diagonal
    incl_tri_h = jnp.broadcast_to(incl_tri[None], (H, C, C))
    eye_k = (lax.broadcasted_iota(jnp.int32, (dk, dk), 0)
             == lax.broadcasted_iota(jnp.int32, (dk, dk), 1)).astype(jnp.float32)

    gnw = gnw_ref[...]                                       # (1, 1, dv)
    S = None                                                 # carried (H, dk, dv) state

    for i in range(n_chunks):                                # static, fully unrolled
        sl = slice(i * C, (i + 1) * C)
        qc, kc, vc = q[:, sl, :], k[:, sl, :], v[:, sl, :]
        gc, gat = log_decay[:, sl, :], g[:, sl, :]

        # inclusive cumulative per-key log-decay via a triangular matmul (no cumsum op)
        b_cum = jnp.einsum("hcd,hdk->hck", incl_tri_h, gc,
                           preferred_element_type=jnp.float32)            # (H, C, dk)
        q_hat = qc * jnp.exp(b_cum) * scale
        k_hat = kc * jnp.exp(-b_cum)

        # intra-chunk: causal-masked (C, C) attention, then (C, C) @ (C, dv)
        A = jnp.einsum("hck,hdk->hcd", q_hat, k_hat,
                       preferred_element_type=jnp.float32) * incl_tri_h   # (H, C, C)
        o_c = jnp.einsum("hcd,hdv->hcv", A, vc, preferred_element_type=jnp.float32)
        if i > 0:
            # inter-chunk contribution from the carried state
            o_c = o_c + jnp.einsum("hck,hkv->hcv", q_hat, S,
                                   preferred_element_type=jnp.float32)

        # carried state update (not needed after the last chunk; final state not returned)
        if i + 1 < n_chunks:
            b_tot = b_cum[:, C - 1:C, :]                                  # (H, 1, dk)
            k_carry = kc * jnp.exp(b_tot - b_cum)                         # (H, C, dk)
            kv = jnp.einsum("hck,hcv->hkv", k_carry, vc,
                            preferred_element_type=jnp.float32)           # (H, dk, dv)
            if i == 0:
                S = kv
            else:
                decay_diag = eye_k[None] * jnp.exp(b_tot)                 # (H, dk, dk)
                S = jnp.einsum("hkj,hjv->hkv", decay_diag, S,
                               preferred_element_type=jnp.float32) + kv

        # ---- fused epilogue: RMSNorm + swish gate + output projection ----
        var = jnp.mean(o_c * o_c, axis=-1, keepdims=True)                 # (H, C, 1)
        o_n = o_c * lax.rsqrt(var + EPS) * gnw                            # (H, C, dv)
        o_gated = o_n * (gat * jax.nn.sigmoid(gat))

        out_c = jnp.zeros((C, hidden), jnp.float32)
        for h in range(H):                                                # static unroll
            out_c = out_c + jnp.dot(o_gated[h], wo_ref[h],
                                    preferred_element_type=jnp.float32)
        out_ref[pl.ds(i * C, C), :] = out_c


def gla_forward(x, p):
    B, L, _ = x.shape
    C = min(L, CHUNK)
    assert L % C == 0, "sequence length must be a multiple of the chunk size"

    # One-time tiny weight re-arrangements (head split done here so the kernel never
    # slices activations along the lane axis).
    WqT = p["Wq"].T.reshape(HIDDEN, NUM_HEADS, HEAD_QK).transpose(1, 0, 2)       # (H, C, dk)
    WkT = p["Wk"].T.reshape(HIDDEN, NUM_HEADS, HEAD_QK).transpose(1, 0, 2)
    WvT = p["Wv"].T.reshape(HIDDEN, NUM_HEADS, HEAD_V).transpose(1, 0, 2)        # (H, C, dv)
    WgT = p["Wg"].T.reshape(HIDDEN, NUM_HEADS, HEAD_V).transpose(1, 0, 2)
    Wgk1T = p["Wgk1"].T                                                          # (C, R)
    Wgk2T = p["Wgk2"].T.reshape(GATE_LOW_RANK, NUM_HEADS, HEAD_QK).transpose(1, 0, 2)
    bgk2 = p["bgk2"].reshape(NUM_HEADS, 1, HEAD_QK)
    WoT = p["Wo"].T.reshape(NUM_HEADS, HEAD_V, HIDDEN)                           # (H, dv, C)
    gnw = p["g_norm_w"].reshape(1, 1, HEAD_V)

    def full(shape):
        return pl.BlockSpec(shape, lambda b, _n=len(shape): (0,) * _n)

    return pl.pallas_call(
        _gla_fused_kernel,
        out_shape=jax.ShapeDtypeStruct((B, L, HIDDEN), jnp.float32),
        grid=(B,),
        in_specs=[
            pl.BlockSpec((None, L, HIDDEN), lambda b: (b, 0, 0)),
            full((NUM_HEADS, HIDDEN, HEAD_QK)),
            full((NUM_HEADS, HIDDEN, HEAD_QK)),
            full((NUM_HEADS, HIDDEN, HEAD_V)),
            full((NUM_HEADS, HIDDEN, HEAD_V)),
            full((HIDDEN, GATE_LOW_RANK)),
            full((NUM_HEADS, GATE_LOW_RANK, HEAD_QK)),
            full((NUM_HEADS, 1, HEAD_QK)),
            full((NUM_HEADS, HEAD_V, HIDDEN)),
            full((1, 1, HEAD_V)),
        ],
        out_specs=pl.BlockSpec((None, L, HIDDEN), lambda b: (b, 0, 0)),
        compiler_params=pltpu.CompilerParams(dimension_semantics=("parallel",)),
    )(x, WqT, WkT, WvT, WgT, Wgk1T, Wgk2T, bgk2, WoT, gnw)


# ----------------------------- parameters -----------------------------
def init_params(key):
    """Deterministic init matching the module: xavier_uniform(gain=2**-2.5) for Linear
    weights, zeros for the gk bias, ones for the RMSNorm weight."""
    gain = 2.0 ** -2.5

    def xavier(k, out_dim, in_dim):
        bound = gain * math.sqrt(6.0 / (in_dim + out_dim))
        return jax.random.uniform(k, (out_dim, in_dim), jnp.float32, -bound, bound)

    ks = jax.random.split(key, 7)
    return dict(
        Wq=xavier(ks[0], KEY_DIM, HIDDEN),
        Wk=xavier(ks[1], KEY_DIM, HIDDEN),
        Wv=xavier(ks[2], VALUE_DIM, HIDDEN),
        Wg=xavier(ks[3], VALUE_DIM, HIDDEN),
        Wgk1=xavier(ks[4], GATE_LOW_RANK, HIDDEN),
        Wgk2=xavier(ks[5], KEY_DIM, GATE_LOW_RANK),
        bgk2=jnp.zeros((KEY_DIM,), jnp.float32),
        Wo=xavier(ks[6], HIDDEN, VALUE_DIM),
        g_norm_w=jnp.ones((HEAD_V,), jnp.float32),
    )


# ----------------------------- pure-JAX reference -----------------------------
def reference_forward(x, p):
    B, L, _ = x.shape
    x2 = x.reshape(B * L, HIDDEN)
    q = x2 @ p["Wq"].T
    k = x2 @ p["Wk"].T
    v = x2 @ p["Wv"].T
    g = x2 @ p["Wg"].T
    gk = (x2 @ p["Wgk1"].T) @ p["Wgk2"].T + p["bgk2"]

    def to_heads(t, d):
        return t.reshape(B, L, NUM_HEADS, d).transpose(0, 2, 1, 3)

    qh, kh, gkh = to_heads(q, HEAD_QK), to_heads(k, HEAD_QK), to_heads(gk, HEAD_QK)
    vh = to_heads(v, HEAD_V)
    gkh = jax.nn.log_sigmoid(gkh) / GATE_LOGIT_NORMALIZER

    scale = HEAD_QK ** -0.5
    S = jnp.zeros((B, NUM_HEADS, HEAD_QK, HEAD_V), jnp.float32)
    outs = []
    for t in range(L):
        S = (jnp.exp(gkh[:, :, t, :])[..., None] * S
             + kh[:, :, t, :, None] * vh[:, :, t, None, :])
        outs.append(jnp.einsum("bhk,bhkv->bhv", qh[:, :, t, :] * scale, S))
    o = jnp.stack(outs, axis=2).transpose(0, 2, 1, 3)        # (B, L, H, HEAD_V)

    gh = g.reshape(B, L, NUM_HEADS, HEAD_V)
    var = jnp.mean(o * o, axis=-1, keepdims=True)
    o = o * lax.rsqrt(var + EPS) * p["g_norm_w"]
    o = o * (gh * jax.nn.sigmoid(gh))
    o = o.reshape(B * L, VALUE_DIM)
    return (o @ p["Wo"].T).reshape(B, L, HIDDEN)


# ----------------------------- main -----------------------------
if __name__ == "__main__":
    key = jax.random.PRNGKey(0)
    pkey, xkey = jax.random.split(key)
    params = init_params(pkey)

    B, L = 2, 8
    x = jax.random.normal(xkey, (B, L, HIDDEN), jnp.float32)

    out = jax.jit(gla_forward)(x, params)
    out = jax.block_until_ready(out)

    ref = reference_forward(x, params)
    assert out.shape == (B, L, HIDDEN), out.shape
    max_err = float(jnp.max(jnp.abs(out - ref)))
    assert jnp.allclose(out, ref, rtol=1e-3, atol=1e-4), f"max abs err {max_err}"

    print("KERNEL_OK")
</pallas_src>

<mosaic_0001>
module attributes {stable_mosaic.version = 11 : i64} {
  func.func @_gla_fused_kernel(%arg0: i32, %arg1: memref<1x8x32xf32, #tpu.memory_space<vmem>>, %arg2: memref<4x32x8xf32, #tpu.memory_space<vmem>>, %arg3: memref<4x32x8xf32, #tpu.memory_space<vmem>>, %arg4: memref<4x32x16xf32, #tpu.memory_space<vmem>>, %arg5: memref<4x32x16xf32, #tpu.memory_space<vmem>>, %arg6: memref<32x16xf32, #tpu.memory_space<vmem>>, %arg7: memref<4x16x8xf32, #tpu.memory_space<vmem>>, %arg8: memref<4x1x8xf32, #tpu.memory_space<vmem>>, %arg9: memref<4x16x32xf32, #tpu.memory_space<vmem>>, %arg10: memref<1x1x16xf32, #tpu.memory_space<vmem>>, %arg11: memref<1x8x32xf32, #tpu.memory_space<vmem>>) attributes {dimension_semantics = [#tpu.dimension_semantics<parallel>], iteration_bounds = array<i64: 2>, scalar_prefetch = 0 : i64, scratch_operands = 0 : i64, tpu.core_type = #tpu.core_type<tc>, window_params = [{transform_indices = @transform_0, window_bounds = array<i64: 1, 8, 32>}, {pipeline_mode = #tpu.pipeline_mode<synchronous>, transform_indices = @transform_1, window_bounds = array<i64: 4, 32, 8>}, {pipeline_mode = #tpu.pipeline_mode<synchronous>, transform_indices = @transform_2, window_bounds = array<i64: 4, 32, 8>}, {pipeline_mode = #tpu.pipeline_mode<synchronous>, transform_indices = @transform_3, window_bounds = array<i64: 4, 32, 16>}, {pipeline_mode = #tpu.pipeline_mode<synchronous>, transform_indices = @transform_4, window_bounds = array<i64: 4, 32, 16>}, {pipeline_mode = #tpu.pipeline_mode<synchronous>, transform_indices = @transform_5, window_bounds = array<i64: 32, 16>}, {pipeline_mode = #tpu.pipeline_mode<synchronous>, transform_indices = @transform_6, window_bounds = array<i64: 4, 16, 8>}, {pipeline_mode = #tpu.pipeline_mode<synchronous>, transform_indices = @transform_7, window_bounds = array<i64: 4, 1, 8>}, {pipeline_mode = #tpu.pipeline_mode<synchronous>, transform_indices = @transform_8, window_bounds = array<i64: 4, 16, 32>}, {pipeline_mode = #tpu.pipeline_mode<synchronous>, transform_indices = @transform_9, window_bounds = array<i64: 1, 1, 16>}, {transform_indices = @transform_10, window_bounds = array<i64: 1, 8, 32>}]} {
    %c0 = arith.constant 0 : index
    %c0_0 = arith.constant 0 : index
    %c0_1 = arith.constant 0 : index
    %0 = vector.load %arg1[%c0, %c0_0, %c0_1] : memref<1x8x32xf32, #tpu.memory_space<vmem>>, vector<1x8x32xf32>
    %1 = vector.shape_cast %0 : vector<1x8x32xf32> to vector<8x32xf32>
    %2 = vector.shape_cast %1 : vector<8x32xf32> to vector<1x8x32xf32>
    %3 = vector.shape_cast %2 : vector<1x8x32xf32> to vector<1x8x32xf32>
    %4 = vector.broadcast %3 : vector<1x8x32xf32> to vector<4x8x32xf32>
    %c0_2 = arith.constant 0 : index
    %c0_3 = arith.constant 0 : index
    %c0_4 = arith.constant 0 : index
    %5 = vector.load %arg2[%c0_2, %c0_3, %c0_4] : memref<4x32x8xf32, #tpu.memory_space<vmem>>, vector<4x32x8xf32>
    "tpu.trace_start"() <{level = 10 : i32, message = "hlc,hck->hlk"}> : () -> ()
    %cst = arith.constant dense<0.000000e+00> : vector<4x8x8xf32>
    %6 = tpu.matmul %4, %5, %cst {dimension_numbers = #tpu.dot_dimension_numbers<[2], [1], [1], [2], [0, 0, 0, 1, 1, 2], [0], [0]>} : vector<4x8x32xf32>, vector<4x32x8xf32>, vector<4x8x8xf32> -> vector<4x8x8xf32>
    "tpu.trace_stop"() : () -> ()
    %c0_5 = arith.constant 0 : index
    %c0_6 = arith.constant 0 : index
    %c0_7 = arith.constant 0 : index
    %7 = vector.load %arg3[%c0_5, %c0_6, %c0_7] : memref<4x32x8xf32, #tpu.memory_space<vmem>>, vector<4x32x8xf32>
    "tpu.trace_start"() <{level = 10 : i32, message = "hlc,hck->hlk"}> : () -> ()
    %cst_8 = arith.constant dense<0.000000e+00> : vector<4x8x8xf32>
    %8 = tpu.matmul %4, %7, %cst_8 {dimension_numbers = #tpu.dot_dimension_numbers<[2], [1], [1], [2], [0, 0, 0, 1, 1, 2], [0], [0]>} : vector<4x8x32xf32>, vector<4x32x8xf32>, vector<4x8x8xf32> -> vector<4x8x8xf32>
    "tpu.trace_stop"() : () -> ()
    %c0_9 = arith.constant 0 : index
    %c0_10 = arith.constant 0 : index
    %c0_11 = arith.constant 0 : index
    %9 = vector.load %arg4[%c0_9, %c0_10, %c0_11] : memref<4x32x16xf32, #tpu.memory_space<vmem>>, vector<4x32x16xf32>
    "tpu.trace_start"() <{level = 10 : i32, message = "hlc,hcv->hlv"}> : () -> ()
    %cst_12 = arith.constant dense<0.000000e+00> : vector<4x8x16xf32>
    %10 = tpu.matmul %4, %9, %cst_12 {dimension_numbers = #tpu.dot_dimension_numbers<[2], [1], [1], [2], [0, 0, 0, 1, 1, 2], [0], [0]>} : vector<4x8x32xf32>, vector<4x32x16xf32>, vector<4x8x16xf32> -> vector<4x8x16xf32>
    "tpu.trace_stop"() : () -> ()
    %c0_13 = arith.constant 0 : index
    %c0_14 = arith.constant 0 : index
    %c0_15 = arith.constant 0 : index
    %11 = vector.load %arg5[%c0_13, %c0_14, %c0_15] : memref<4x32x16xf32, #tpu.memory_space<vmem>>, vector<4x32x16xf32>
    "tpu.trace_start"() <{level = 10 : i32, message = "hlc,hcv->hlv"}> : () -> ()
    %cst_16 = arith.constant dense<0.000000e+00> : vector<4x8x16xf32>
    %12 = tpu.matmul %4, %11, %cst_16 {dimension_numbers = #tpu.dot_dimension_numbers<[2], [1], [1], [2], [0, 0, 0, 1, 1, 2], [0], [0]>} : vector<4x8x32xf32>, vector<4x32x16xf32>, vector<4x8x16xf32> -> vector<4x8x16xf32>
    "tpu.trace_stop"() : () -> ()
    %c0_17 = arith.constant 0 : index
    %c0_18 = arith.constant 0 : index
    %13 = vector.load %arg6[%c0_17, %c0_18] : memref<32x16xf32, #tpu.memory_space<vmem>>, vector<32x16xf32>
    %cst_19 = arith.constant dense<0.000000e+00> : vector<8x16xf32>
    %14 = tpu.matmul %1, %13, %cst_19 {dimension_numbers = #tpu.dot_dimension_numbers<[1], [0], [0], [1], [0, 0, 1, 1], [], []>} : vector<8x32xf32>, vector<32x16xf32>, vector<8x16xf32> -> vector<8x16xf32>
    %15 = vector.shape_cast %14 : vector<8x16xf32> to vector<1x8x16xf32>
    %16 = vector.shape_cast %15 : vector<1x8x16xf32> to vector<1x8x16xf32>
    %17 = vector.broadcast %16 : vector<1x8x16xf32> to vector<4x8x16xf32>
    %c0_20 = arith.constant 0 : index
    %c0_21 = arith.constant 0 : index
    %c0_22 = arith.constant 0 : index
    %18 = vector.load %arg7[%c0_20, %c0_21, %c0_22] : memref<4x16x8xf32, #tpu.memory_space<vmem>>, vector<4x16x8xf32>
    "tpu.trace_start"() <{level = 10 : i32, message = "hlr,hrk->hlk"}> : () -> ()
    %cst_23 = arith.constant dense<0.000000e+00> : vector<4x8x8xf32>
    %19 = tpu.matmul %17, %18, %cst_23 {dimension_numbers = #tpu.dot_dimension_numbers<[2], [1], [1], [2], [0, 0, 0, 1, 1, 2], [0], [0]>} : vector<4x8x16xf32>, vector<4x16x8xf32>, vector<4x8x8xf32> -> vector<4x8x8xf32>
    "tpu.trace_stop"() : () -> ()
    %c0_24 = arith.constant 0 : index
    %c0_25 = arith.constant 0 : index
    %c0_26 = arith.constant 0 : index
    %20 = vector.load %arg8[%c0_24, %c0_25, %c0_26] : memref<4x1x8xf32, #tpu.memory_space<vmem>>, vector<4x1x8xf32>
    %21 = vector.broadcast %20 : vector<4x1x8xf32> to vector<4x8x8xf32>
    %22 = arith.addf %19, %21 : vector<4x8x8xf32>
    %cst_27 = arith.constant 0.000000e+00 : f32
    %23 = vector.broadcast %cst_27 : f32 to vector<4x8x8xf32>
    %24 = arith.minimumf %22, %23 : vector<4x8x8xf32>
    %25 = math.absf %22 : vector<4x8x8xf32>
    %cst_28 = arith.constant 0.000000e+00 : f32
    %26 = vector.broadcast %cst_28 : f32 to vector<4x8x8xf32>
    %27 = arith.subf %26, %25 : vector<4x8x8xf32>
    %28 = math.exp %27 : vector<4x8x8xf32>
    %cst_29 = arith.constant 1.000000e+00 : f32
    %29 = vector.broadcast %cst_29 : f32 to vector<4x8x8xf32>
    %30 = arith.addf %29, %28 : vector<4x8x8xf32>
    %31 = math.log %30 : vector<4x8x8xf32>
    %32 = arith.subf %24, %31 : vector<4x8x8xf32>
    %cst_30 = arith.constant 1.600000e+01 : f32
    %33 = vector.broadcast %cst_30 : f32 to vector<4x8x8xf32>
    %34 = arith.divf %32, %33 : vector<4x8x8xf32>
    %35 = tpu.iota {dimensions = array<i32: 0>} : vector<8x8xi32>
    %36 = tpu.iota {dimensions = array<i32: 1>} : vector<8x8xi32>
    %37 = arith.cmpi sle, %36, %35 : vector<8x8xi32>
    %38 = arith.extui %37 : vector<8x8xi1> to vector<8x8xi32>
    %39 = arith.sitofp %38 : vector<8x8xi32> to vector<8x8xf32>
    %40 = vector.shape_cast %39 : vector<8x8xf32> to vector<1x8x8xf32>
    %41 = vector.shape_cast %40 : vector<1x8x8xf32> to vector<1x8x8xf32>
    %42 = vector.broadcast %41 : vector<1x8x8xf32> to vector<4x8x8xf32>
    %c0_31 = arith.constant 0 : index
    %c0_32 = arith.constant 0 : index
    %c0_33 = arith.constant 0 : index
    %43 = vector.load %arg10[%c0_31, %c0_32, %c0_33] : memref<1x1x16xf32, #tpu.memory_space<vmem>>, vector<1x1x16xf32>
    "tpu.trace_start"() <{level = 10 : i32, message = "hcd,hdk->hck"}> : () -> ()
    %cst_34 = arith.constant dense<0.000000e+00> : vector<4x8x8xf32>
    %44 = tpu.matmul %42, %34, %cst_34 {dimension_numbers = #tpu.dot_dimension_numbers<[2], [1], [1], [2], [0, 0, 0, 1, 1, 2], [0], [0]>} : vector<4x8x8xf32>, vector<4x8x8xf32>, vector<4x8x8xf32> -> vector<4x8x8xf32>
    "tpu.trace_stop"() : () -> ()
    %45 = math.exp %44 : vector<4x8x8xf32>
    %46 = arith.mulf %6, %45 : vector<4x8x8xf32>
    %cst_35 = arith.constant 0.353553385 : f32
    %47 = vector.broadcast %cst_35 : f32 to vector<4x8x8xf32>
    %48 = arith.mulf %46, %47 : vector<4x8x8xf32>
    %cst_36 = arith.constant 0.000000e+00 : f32
    %49 = vector.broadcast %cst_36 : f32 to vector<4x8x8xf32>
    %50 = arith.subf %49, %44 : vector<4x8x8xf32>
    %51 = math.exp %50 : vector<4x8x8xf32>
    %52 = arith.mulf %8, %51 : vector<4x8x8xf32>
    "tpu.trace_start"() <{level = 10 : i32, message = "hck,hdk->hcd"}> : () -> ()
    %cst_37 = arith.constant dense<0.000000e+00> : vector<4x8x8xf32>
    %53 = tpu.matmul %48, %52, %cst_37 {dimension_numbers = #tpu.dot_dimension_numbers<[2], [2], [1], [1], [0, 0, 0, 1, 1, 1], [0], [0]>} : vector<4x8x8xf32>, vector<4x8x8xf32>, vector<4x8x8xf32> -> vector<4x8x8xf32>
    "tpu.trace_stop"() : () -> ()
    %54 = arith.mulf %53, %42 : vector<4x8x8xf32>
    "tpu.trace_start"() <{level = 10 : i32, message = "hcd,hdv->hcv"}> : () -> ()
    %cst_38 = arith.constant dense<0.000000e+00> : vector<4x8x16xf32>
    %55 = tpu.matmul %54, %10, %cst_38 {dimension_numbers = #tpu.dot_dimension_numbers<[2], [1], [1], [2], [0, 0, 0, 1, 1, 2], [0], [0]>} : vector<4x8x8xf32>, vector<4x8x16xf32>, vector<4x8x16xf32> -> vector<4x8x16xf32>
    "tpu.trace_stop"() : () -> ()
    %56 = arith.mulf %55, %55 : vector<4x8x16xf32>
    %cst_39 = arith.constant dense<0.000000e+00> : vector<4x8xf32>
    %57 = vector.multi_reduction <add>, %56, %cst_39 [2] : vector<4x8x16xf32> to vector<4x8xf32>
    %58 = vector.shape_cast %57 : vector<4x8xf32> to vector<4x8x1xf32>
    %cst_40 = arith.constant 1.600000e+01 : f32
    %59 = vector.broadcast %cst_40 : f32 to vector<4x8x1xf32>
    %60 = arith.divf %58, %59 : vector<4x8x1xf32>
    %cst_41 = arith.constant 9.99999974E-6 : f32
    %61 = vector.broadcast %cst_41 : f32 to vector<4x8x1xf32>
    %62 = arith.addf %60, %61 : vector<4x8x1xf32>
    %63 = math.rsqrt %62 : vector<4x8x1xf32>
    %64 = vector.broadcast %63 : vector<4x8x1xf32> to vector<4x8x16xf32>
    %65 = arith.mulf %55, %64 : vector<4x8x16xf32>
    %66 = vector.broadcast %43 : vector<1x1x16xf32> to vector<4x8x16xf32>
    %67 = arith.mulf %65, %66 : vector<4x8x16xf32>
    %68 = arith.negf %12 : vector<4x8x16xf32>
    %69 = math.exp %68 : vector<4x8x16xf32>
    %cst_42 = arith.constant 1.000000e+00 : f32
    %70 = vector.broadcast %cst_42 : f32 to vector<4x8x16xf32>
    %71 = arith.addf %70, %69 : vector<4x8x16xf32>
    %72 = arith.divf %70, %71 : vector<4x8x16xf32>
    %73 = arith.mulf %12, %72 : vector<4x8x16xf32>
    %74 = arith.mulf %67, %73 : vector<4x8x16xf32>
    %cst_43 = arith.constant 0.000000e+00 : f32
    %75 = vector.broadcast %cst_43 : f32 to vector<8x32xf32>
    %76 = vector.extract_strided_slice %74 {offsets = [0, 0, 0], sizes = [1, 8, 16], strides = [1, 1, 1]} : vector<4x8x16xf32> to vector<1x8x16xf32>
    %77 = vector.shape_cast %76 : vector<1x8x16xf32> to vector<8x16xf32>
    %c0_44 = arith.constant 0 : index
    %c0_45 = arith.constant 0 : index
    %c0_46 = arith.constant 0 : index
    %78 = vector.load %arg9[%c0_44, %c0_45, %c0_46] : memref<4x16x32xf32, #tpu.memory_space<vmem>>, vector<1x16x32xf32>
    %79 = vector.shape_cast %78 : vector<1x16x32xf32> to vector<16x32xf32>
    %cst_47 = arith.constant dense<0.000000e+00> : vector<8x32xf32>
    %80 = tpu.matmul %77, %79, %cst_47 {dimension_numbers = #tpu.dot_dimension_numbers<[1], [0], [0], [1], [0, 0, 1, 1], [], []>} : vector<8x16xf32>, vector<16x32xf32>, vector<8x32xf32> -> vector<8x32xf32>
    %81 = arith.addf %75, %80 : vector<8x32xf32>
    %82 = vector.extract_strided_slice %74 {offsets = [1, 0, 0], sizes = [1, 8, 16], strides = [1, 1, 1]} : vector<4x8x16xf32> to vector<1x8x16xf32>
    %83 = vector.shape_cast %82 : vector<1x8x16xf32> to vector<8x16xf32>
    %c1 = arith.constant 1 : index
    %c0_48 = arith.constant 0 : index
    %c0_49 = arith.constant 0 : index
    %84 = vector.load %arg9[%c1, %c0_48, %c0_49] : memref<4x16x32xf32, #tpu.memory_space<vmem>>, vector<1x16x32xf32>
    %85 = vector.shape_cast %84 : vector<1x16x32xf32> to vector<16x32xf32>
    %cst_50 = arith.constant dense<0.000000e+00> : vector<8x32xf32>
    %86 = tpu.matmul %83, %85, %cst_50 {dimension_numbers = #tpu.dot_dimension_numbers<[1], [0], [0], [1], [0, 0, 1, 1], [], []>} : vector<8x16xf32>, vector<16x32xf32>, vector<8x32xf32> -> vector<8x32xf32>
    %87 = arith.addf %81, %86 : vector<8x32xf32>
    %88 = vector.extract_strided_slice %74 {offsets = [2, 0, 0], sizes = [1, 8, 16], strides = [1, 1, 1]} : vector<4x8x16xf32> to vector<1x8x16xf32>
    %89 = vector.shape_cast %88 : vector<1x8x16xf32> to vector<8x16xf32>
    %c2 = arith.constant 2 : index
    %c0_51 = arith.constant 0 : index
    %c0_52 = arith.constant 0 : index
    %90 = vector.load %arg9[%c2, %c0_51, %c0_52] : memref<4x16x32xf32, #tpu.memory_space<vmem>>, vector<1x16x32xf32>
    %91 = vector.shape_cast %90 : vector<1x16x32xf32> to vector<16x32xf32>
    %cst_53 = arith.constant dense<0.000000e+00> : vector<8x32xf32>
    %92 = tpu.matmul %89, %91, %cst_53 {dimension_numbers = #tpu.dot_dimension_numbers<[1], [0], [0], [1], [0, 0, 1, 1], [], []>} : vector<8x16xf32>, vector<16x32xf32>, vector<8x32xf32> -> vector<8x32xf32>
    %93 = arith.addf %87, %92 : vector<8x32xf32>
    %94 = vector.extract_strided_slice %74 {offsets = [3, 0, 0], sizes = [1, 8, 16], strides = [1, 1, 1]} : vector<4x8x16xf32> to vector<1x8x16xf32>
    %95 = vector.shape_cast %94 : vector<1x8x16xf32> to vector<8x16xf32>
    %c3 = arith.constant 3 : index
    %c0_54 = arith.constant 0 : index
    %c0_55 = arith.constant 0 : index
    %96 = vector.load %arg9[%c3, %c0_54, %c0_55] : memref<4x16x32xf32, #tpu.memory_space<vmem>>, vector<1x16x32xf32>
    %97 = vector.shape_cast %96 : vector<1x16x32xf32> to vector<16x32xf32>
    %cst_56 = arith.constant dense<0.000000e+00> : vector<8x32xf32>
    %98 = tpu.matmul %95, %97, %cst_56 {dimension_numbers = #tpu.dot_dimension_numbers<[1], [0], [0], [1], [0, 0, 1, 1], [], []>} : vector<8x16xf32>, vector<16x32xf32>, vector<8x32xf32> -> vector<8x32xf32>
    %99 = arith.addf %93, %98 : vector<8x32xf32>
    %c0_57 = arith.constant 0 : index
    %c0_58 = arith.constant 0 : index
    %c0_59 = arith.constant 0 : index
    %100 = vector.load %arg11[%c0_57, %c0_58, %c0_59] : memref<1x8x32xf32, #tpu.memory_space<vmem>>, vector<1x8x32xf32>
    %101 = vector.shape_cast %100 : vector<1x8x32xf32> to vector<8x32xf32>
    %102 = vector.shape_cast %99 : vector<8x32xf32> to vector<1x8x32xf32>
    tpu.vector_store %arg11[%c0_57, %c0_58, %c0_59], %102 {strides = array<i32>} : memref<1x8x32xf32, #tpu.memory_space<vmem>>, vector<1x8x32xf32>,
    return
  }
  func.func @transform_0(%arg0: i32) -> (i32, i32, i32) {
    %c0_i32 = arith.constant 0 : i32
    %c0_i32_0 = arith.constant 0 : i32
    %c0_i32_1 = arith.constant 0 : i32
    return %arg0, %c0_i32, %c0_i32_0 : i32, i32, i32
  }
  func.func @transform_1(%arg0: i32) -> (i32, i32, i32) {
    %c0_i32 = arith.constant 0 : i32
    %c0_i32_0 = arith.constant 0 : i32
    %c0_i32_1 = arith.constant 0 : i32
    %c0_i32_2 = arith.constant 0 : i32
    return %c0_i32, %c0_i32_0, %c0_i32_1 : i32, i32, i32
  }
  func.func @transform_2(%arg0: i32) -> (i32, i32, i32) {
    %c0_i32 = arith.constant 0 : i32
    %c0_i32_0 = arith.constant 0 : i32
    %c0_i32_1 = arith.constant 0 : i32
    %c0_i32_2 = arith.constant 0 : i32
    return %c0_i32, %c0_i32_0, %c0_i32_1 : i32, i32, i32
  }
  func.func @transform_3(%arg0: i32) -> (i32, i32, i32) {
    %c0_i32 = arith.constant 0 : i32
    %c0_i32_0 = arith.constant 0 : i32
    %c0_i32_1 = arith.constant 0 : i32
    %c0_i32_2 = arith.constant 0 : i32
    return %c0_i32, %c0_i32_0, %c0_i32_1 : i32, i32, i32
  }
  func.func @transform_4(%arg0: i32) -> (i32, i32, i32) {
    %c0_i32 = arith.constant 0 : i32
    %c0_i32_0 = arith.constant 0 : i32
    %c0_i32_1 = arith.constant 0 : i32
    %c0_i32_2 = arith.constant 0 : i32
    return %c0_i32, %c0_i32_0, %c0_i32_1 : i32, i32, i32
  }
  func.func @transform_5(%arg0: i32) -> (i32, i32) {
    %c0_i32 = arith.constant 0 : i32
    %c0_i32_0 = arith.constant 0 : i32
    %c0_i32_1 = arith.constant 0 : i32
    return %c0_i32, %c0_i32_0 : i32, i32
  }
  func.func @transform_6(%arg0: i32) -> (i32, i32, i32) {
    %c0_i32 = arith.constant 0 : i32
    %c0_i32_0 = arith.constant 0 : i32
    %c0_i32_1 = arith.constant 0 : i32
    %c0_i32_2 = arith.constant 0 : i32
    return %c0_i32, %c0_i32_0, %c0_i32_1 : i32, i32, i32
  }
  func.func @transform_7(%arg0: i32) -> (i32, i32, i32) {
    %c0_i32 = arith.constant 0 : i32
    %c0_i32_0 = arith.constant 0 : i32
    %c0_i32_1 = arith.constant 0 : i32
    %c0_i32_2 = arith.constant 0 : i32
    return %c0_i32, %c0_i32_0, %c0_i32_1 : i32, i32, i32
  }
  func.func @transform_8(%arg0: i32) -> (i32, i32, i32) {
    %c0_i32 = arith.constant 0 : i32
    %c0_i32_0 = arith.constant 0 : i32
    %c0_i32_1 = arith.constant 0 : i32
    %c0_i32_2 = arith.constant 0 : i32
    return %c0_i32, %c0_i32_0, %c0_i32_1 : i32, i32, i32
  }
  func.func @transform_9(%arg0: i32) -> (i32, i32, i32) {
    %c0_i32 = arith.constant 0 : i32
    %c0_i32_0 = arith.constant 0 : i32
    %c0_i32_1 = arith.constant 0 : i32
    %c0_i32_2 = arith.constant 0 : i32
    return %c0_i32, %c0_i32_0, %c0_i32_1 : i32, i32, i32
  }
  func.func @transform_10(%arg0: i32) -> (i32, i32, i32) {
    %c0_i32 = arith.constant 0 : i32
    %c0_i32_0 = arith.constant 0 : i32
    %c0_i32_1 = arith.constant 0 : i32
    return %arg0, %c0_i32, %c0_i32_0 : i32, i32, i32
  }
}

</mosaic_0001>

<bundles_post_ra>
// kernel: gla_forward.1
= control target key start
LH: loop header
LB: loop body
LE: loop exit
PB: predicated region body
PF: predicated region fallthrough
CT: control target
= control target key end

     0   :  { %15 = vsyncpa [#allocation3], 0  ;;  %s4855_s0 = inlined_call_operand.vmem [shape: f32[2,8,32], index: 0, kind: input, shape index: {}]   ;;  %s4856_s1 = inlined_call_operand.vmem [shape: f32[4,32,8], index: 1, kind: input, shape index: {}]   ;;  %s4857_s2 = inlined_call_operand.vmem [shape: f32[4,32,8], index: 2, kind: input, shape index: {}]   ;;  %s4858_s3 = inlined_call_operand.vmem [shape: f32[4,32,16], index: 3, kind: input, shape index: {}]   ;;  %s4859_s4 = inlined_call_operand.vmem [shape: f32[4,32,16], index: 4, kind: input, shape index: {}]   ;;  %s4860_s5 = inlined_call_operand.vmem [shape: f32[32,16], index: 5, kind: input, shape index: {}]   ;;  %s4861_s6 = inlined_call_operand.vmem [shape: f32[4,16,8], index: 6, kind: input, shape index: {}]   ;;  %s4862_s7 = inlined_call_operand.vmem [shape: f32[4,1,8], index: 7, kind: input, shape index: {}]   ;;  %s4863_s8 = inlined_call_operand.vmem [shape: f32[4,16,32], index: 8, kind: input, shape index: {}]   ;;  %s4864_s9 = inlined_call_operand.vmem [shape: f32[1,1,16], index: 9, kind: input, shape index: {}]   ;;  %s4865_s10 = inlined_call_operand.hbm [shape: f32[2,8,32], index: 10, kind: output, shape index: {}]  }
   0x1   :  { %17 = vsyncpa [#allocation3 + $0x1], 0  ;;  %s4212_s13 = smov 0   ;;  %s4214_s14 = smov 0  }
   0x2   :  { %s4216_s15 = smov 0   ;;  %s4218_s16 = smov 0  }
   0x3 LB: > { %s4233_s17 = sadd.s32 4294967295, %s4151_s16   ;;  %s3356_s18 = sadd.s32 4294967294, %s4151_s16   ;;  %s4151_s16 = sphi %s4218_s16, %s4871_s16   ;;  %s4147_s15 = sphi %s4216_s15, %s4870_s15   ;;  %s4143_s14 = sphi %s4214_s14, %s4869_s14   ;;  %s4139_s13 = sphi %s4212_s13, %s4868_s13  }
   0x4   : > { %s4237_s19 = sadd.s32 1, %s4151_s16   ;;  %s245_s20 = sadd.s32 1, %s4147_s15 }
   0x5   : > { %s242_s21 = ssub.s32 %s4151_s16, %s4237_s19  ;;  %p255_p0 = scmp.ne.s32.totalorder %s4147_s15, %s4143_s14 }
   0x6   : > { %p243_p1 = scmp.eq.s32.totalorder %s242_s21, 0  ;;  %p256_p2 = scmp.eq.s32.totalorder %s4233_s17, 1 }
   0x7   : > { %p261_p3 = scmp.ne.s32.totalorder %s4143_s14, %s4139_s13  ;;  %p262_p4 = scmp.eq.s32.totalorder %s3356_s18, 1 }
   0x8   : > { %s4248_s22 = scalar_select %p243_p1, %s4147_s15, %s245_s20  }
   0x9   : > { %p4250_p5 = por %p256_p2, %p255_p0  ;;  %p4254_p6 = por %p262_p4, %p261_p3 }
   0xa   : > { %p3359_p7 = scmp.ge.s32.totalorder %s4151_s16, 1  ;;  %p314_p8 = scmp.lt.s32.totalorder %s4151_s16, 3 }
   0xc   : > { %p315_p9 = pnand %p3359_p7, %p314_p8 }
   0xd   : > { %v364_v0 = vld [vmem:[%s4856_s1 + $0x40] sm:$0xff] (!%p315_p9)  ;;  %v365_v1 = vld [vmem:[%s4856_s1 + $0x48] sm:$0xff] (!%p315_p9)  ;;  %v366_v2 = vld [vmem:[%s4856_s1 + $0x50] sm:$0xff] (!%p315_p9)  ;;  %v4153_v3 = vmov (!%p315_p9), 0.0|0.0   ;;  %vm4154_vm0 = vmmov (!%p315_p9), 0   ;;  %v4155_v6 = vmov (!%p315_p9), 0.0  }
   0xe   : > { %318 = sbr.rel (%p315_p9) target bundleno = 1624 (0x658), region = 60  ;;  %3871 = vmatprep.subr.bf16.mxu0 (!%p315_p9), %v4153_v3  ;;  %v3872_v4 = vpack.c.bf16 (!%p315_p9), %v365_v1, %v364_v0  ;;  %v367_v5 = vld [vmem:[%s4856_s1 + $0x58] sm:$0xff] (!%p315_p9)  ;;  %3586 = vmatprep.mubr.msk.f32.mxu0 (!%p315_p9), %vm4154_vm0, %v4155_v6  ;;  %p351_p10 = scmp.lt.s32.totalorder (!%p315_p9), %s4233_s17, 1  ;;  %v656_v8 = vld [vmem:[%s4857_s2] sm:$0xff] (!%p315_p9)  ;;  %v657_v9 = vld [vmem:[%s4857_s2 + $0x8] sm:$0xff] (!%p315_p9)  ;;  %vm372_vm1 = vcmask (!%p315_p9), 261120  }
   0xf   : > { %3859 = vmatprep.subr.bf16.mxu1 (!%p315_p9), %v4153_v3  ;;  %3564 = vmatprep.mubr.msk.f32.mxu1 (!%p315_p9), %vm4154_vm0, %v4155_v6  ;;  %v3875_v7 = vpack.c.bf16 (!%p315_p9), %v367_v5, %v366_v2  ;;  %v3884_v11 = vpack.c.bf16 (!%p315_p9), %v657_v9, %v656_v8  ;;  %v658_v12 = vld [vmem:[%s4857_s2 + $0x10] sm:$0xff] (!%p315_p9)  ;;  %v659_v13 = vld [vmem:[%s4857_s2 + $0x18] sm:$0xff] (!%p315_p9)  ;;  %v356_v15 = vld [vmem:[%s4856_s1] sm:$0xff] (!%p315_p9)  ;;  %vm1654_vm2 = vcmask (!%p315_p9), 130048   ;;  %vm1987_vm4 = vcmask (!%p315_p9), 64512   ;;  %s348_s12 = sand.u32 (!%p315_p9), 1, %s4143_s14  }
  0x10   : > { %3873 = vmatpush3.bf16.msra.mxu0 (!%p315_p9), %v3872_v4  ;;  %v3887_v14 = vpack.c.bf16 (!%p315_p9), %v659_v13, %v658_v12  ;;  %v357_v16 = vld [vmem:[%s4856_s1 + $0x8] sm:$0xff] (!%p315_p9)  ;;  %v358_v17 = vld [vmem:[%s4856_s1 + $0x10] sm:$0xff] (!%p315_p9)  ;;  %v664_v18 = vld [vmem:[%s4857_s2 + $0x40] sm:$0xff] (!%p315_p9)  ;;  %s3360_s20 = sshll.u32 (!%p315_p9), %s348_s12, 3  ;;  %s3420_s21 = sshll.u32 (!%p315_p9), %s4233_s17, 7 }
  0x11   : > { %3874 = vmatprep.subr.bf16.mxu0 (!%p315_p9), %v4153_v3  ;;  %v665_v19 = vld [vmem:[%s4857_s2 + $0x48] sm:$0xff] (!%p315_p9)  ;;  %v3860_v20 = vpack.c.bf16 (!%p315_p9), %v357_v16, %v356_v15  ;;  %v359_v21 = vld [vmem:[%s4856_s1 + $0x18] sm:$0xff] (!%p315_p9)  ;;  %v360_v24 = vld [vmem:[%s4856_s1 + $0x20] sm:$0xff] (!%p315_p9)  ;;  %s4812_s28 = scalar_lea.hbm (!%p315_p9), %s4865_s10, %s3420_s21  ;;  %s3284_s29 = scalar_lea.sflag (!%p315_p9), [#allocation3], %s348_s12 }
  0x12   : > { %v3863_v22 = vpack.c.bf16 (!%p315_p9), %v359_v21, %v358_v17  ;;  %v3896_v23 = vpack.c.bf16 (!%p315_p9), %v665_v19, %v664_v18  ;;  %v361_v25 = vld [vmem:[%s4856_s1 + $0x28] sm:$0xff] (!%p315_p9)  ;;  %v666_v26 = vld [vmem:[%s4857_s2 + $0x50] sm:$0xff] (!%p315_p9)  ;;  %v667_v27 = vld [vmem:[%s4857_s2 + $0x58] sm:$0xff] (!%p315_p9) }
  0x13   : > { %3861 = vmatpush3.bf16.msra.mxu1 (!%p315_p9), %v3860_v20  ;;  %v3866_v28 = vpack.c.bf16 (!%p315_p9), %v361_v25, %v360_v24  ;;  %v3899_v29 = vpack.c.bf16 (!%p315_p9), %v667_v27, %v666_v26  ;;  %v362_v30 = vld [vmem:[%s4856_s1 + $0x30] sm:$0xff] (!%p315_p9)  ;;  %v363_v31 = vld [vmem:[%s4856_s1 + $0x38] sm:$0xff] (!%p315_p9)  ;;  %v952_v32 = vld [vmem:[%s4858_s3] sm:$0xff] (!%p315_p9) }
  0x14   : > { %3876 = vmatpush3.bf16.msra.mxu0 (!%p315_p9), %v3875_v7  ;;  %3862 = vmatprep.subr.bf16.mxu1 (!%p315_p9), %v4153_v3  ;;  %v953_v33 = vld [vmem:[%s4858_s3 + $0x8] sm:$0xff] (!%p315_p9)  ;;  %v3869_v34 = vpack.c.bf16 (!%p315_p9), %v363_v31, %v362_v30  ;;  %v368_v36 = vld [vmem:[%s4856_s1 + $0x60] sm:$0xff] (!%p315_p9)  ;;  %v954_v38 = vld [vmem:[%s4858_s3 + $0x10] sm:$0xff] (!%p315_p9) }
  0x15   : > { %s352_s18 = scalar_select %p351_p10, %s4233_s17, 1  ;;  %3883 = vmatprep.subr.bf16.mxu0 %v4153_v3  ;;  %v3908_v35 = vpack.c.bf16 %v953_v33, %v952_v32  ;;  %v369_v37 = vld [vmem:[%s4856_s1 + $0x68] sm:$0xff]  ;;  %v955_v39 = vld [vmem:[%s4858_s3 + $0x18] sm:$0xff]  ;;  %v370_v42 = vld [vmem:[%s4856_s1 + $0x70] sm:$0xff] }
  0x16   : > { %v3878_v40 = vpack.c.bf16 %v369_v37, %v368_v36  ;;  %v3911_v41 = vpack.c.bf16 %v955_v39, %v954_v38  ;;  %v371_v43 = vld [vmem:[%s4856_s1 + $0x78] sm:$0xff]  ;;  %v960_v44 = vld [vmem:[%s4858_s3 + $0x40] sm:$0xff]  ;;  %v961_v45 = vld [vmem:[%s4858_s3 + $0x48] sm:$0xff]  ;;  %s4156_s17 = smov [#allocation2]  }
  0x17   : > { %s3361_s27 = sshll.u32 %s352_s18, 3  ;;  %3864 = vmatpush3.bf16.msra.mxu1 %v3863_v22  ;;  %v3881_v46 = vpack.c.bf16 %v371_v43, %v370_v42  ;;  %v3920_v47 = vpack.c.bf16 %v961_v45, %v960_v44  ;;  %v660_v48 = vld [vmem:[%s4857_s2 + $0x20] sm:$0xff]  ;;  %v661_v49 = vld [vmem:[%s4857_s2 + $0x28] sm:$0xff]  ;;  %v962_v50 = vld [vmem:[%s4858_s3 + $0x50] sm:$0xff]  ;;  %s350_s18 = scalar_lea.vmem [#allocation2], %s3360_s20 }
  0x18   : > { %s354_s30 = scalar_lea.vmem %s4855_s0, %s3361_s27  ;;  %3865 = vmatprep.subr.bf16.mxu1 %v4153_v3  ;;  %v963_v51 = vld [vmem:[%s4858_s3 + $0x58] sm:$0xff]  ;;  %v3890_v52 = vpack.c.bf16 %v661_v49, %v660_v48  ;;  %v662_v54 = vld [vmem:[%s4857_s2 + $0x30] sm:$0xff]  ;;  %v1248_v56 = vld [vmem:[%s4859_s4] sm:$0xff]  ;;  %s3297_s25 = sshll.u32 %s350_s18, 4  ;;  %s4814_s25 = int_to_ptr.vmem [resolvable:$true] %s3297_s25 }
  0x19   : > { %v4290_v10 = vld [vmem:[%s354_s30] sm:$0xff]  ;;  %v3923_v53 = vpack.c.bf16 %v963_v51, %v962_v50  ;;  %v663_v55 = vld [vmem:[%s4857_s2 + $0x38] sm:$0xff]  ;;  %v1249_v57 = vld [vmem:[%s4859_s4 + $0x8] sm:$0xff]  ;;  %s4089_s30 = scalar_lea.vmem %s4814_s25, 128  ;;  %s4093_s11 = sshll.u32 %s4156_s17, 4  ;;  %s4094_s11 = int_to_ptr.vmem [resolvable:$false] %s4093_s11 }
  0x1a   : > { %3587 = vmatmul.mubr.msk.f32.vlgmr.msra.gmra.mrb[0].mxu0 %vm372_vm1, %v4290_v10  ;;  %3565 = vmatmul.mubr.msk.f32.vlgmr.msra.gmra.mrb[0].mxu1 %vm372_vm1, %v4290_v10  ;;  %v3893_v58 = vpack.c.bf16 %v663_v55, %v662_v54  ;;  %v3932_v59 = vpack.c.bf16 %v1249_v57, %v1248_v56  ;;  %v668_v60 = vld [vmem:[%s4857_s2 + $0x60] sm:$0xff]  ;;  %v669_v61 = vld [vmem:[%s4857_s2 + $0x68] sm:$0xff]  ;;  %v1250_v62 = vld [vmem:[%s4859_s4 + $0x10] sm:$0xff]  ;;  %p4090_p11 = scmp.ne.s32.totalorder %s4814_s25, %s4089_s30  ;;  %s4095_s20 = scalar_lea.vmem %s4094_s11, 256 }
  0x1b   : > { %3885 = vmatpush3.bf16.msra.mxu0 %v3884_v11  ;;  %3608 = vmatprep.mubr.msk.f32.mxu0 %vm4154_vm0, %v4155_v6  ;;  %v1251_v63 = vld [vmem:[%s4859_s4 + $0x18] sm:$0xff]  ;;  %v3902_v0 = vpack.c.bf16 %v669_v61, %v668_v60  ;;  %v670_v2 = vld [vmem:[%s4857_s2 + $0x70] sm:$0xff]  ;;  %v1256_v5 = vld [vmem:[%s4859_s4 + $0x40] sm:$0xff]  ;;  %p4096_p0 = scmp.lt.s32.totalorder %s4814_s25, %s4094_s11  ;;  %p4097_p1 = scmp.lt.s32.totalorder %s4095_s20, %s4089_s30 }
  0x1c   : > { %3886 = vmatprep.subr.bf16.mxu0 %v4153_v3  ;;  %3867 = vmatpush3.bf16.msra.mxu1 %v3866_v28  ;;  %v3935_v1 = vpack.c.bf16 %v1251_v63, %v1250_v62  ;;  %v671_v4 = vld [vmem:[%s4857_s2 + $0x78] sm:$0xff]  ;;  %v1257_v7 = vld [vmem:[%s4859_s4 + $0x48] sm:$0xff]  ;;  %v956_v11 = vld [vmem:[%s4858_s3 + $0x20] sm:$0xff]  ;;  %p4091_p12 = pnand %p4090_p11, %p4250_p5 }
  0x1d   : > { %3575 = vmatprep.mubr.msk.f32.mxu1 %vm4154_vm0, %v4155_v6  ;;  %3868 = vmatprep.subr.bf16.mxu1 %v4153_v3  ;;  %v3905_v8 = vpack.c.bf16 %v671_v4, %v670_v2  ;;  %v3944_v9 = vpack.c.bf16 %v1257_v7, %v1256_v5  ;;  %v957_v12 = vld [vmem:[%s4858_s3 + $0x28] sm:$0xff]  ;;  %v1258_v13 = vld [vmem:[%s4859_s4 + $0x50] sm:$0xff]  ;;  %v1544_v17 = vld [vmem:[%s4860_s5] sm:$0xff]  ;;  %p4098_p2 = por %p4097_p1, %p4096_p0 }
  0x1e   : > { %v3914_v15 = vpack.c.bf16 %v957_v12, %v956_v11  ;;  %v1545_v18 = vld [vmem:[%s4860_s5 + $0x8] sm:$0xff]  ;;  %v1546_v20 = vld [vmem:[%s4860_s5 + $0x10] sm:$0xff]  ;;  %v1547_v21 = vld [vmem:[%s4860_s5 + $0x18] sm:$0xff]  ;;  %p4092_p13 = pneg %p4091_p12 }
  0x1f   : > { %3888 = vmatpush3.bf16.msra.mxu0 %v3887_v14  ;;  %v1259_v14 = vld [vmem:[%s4859_s4 + $0x58] sm:$0xff]  ;;  %v3956_v19 = vpack.c.bf16 %v1545_v18, %v1544_v17  ;;  %v3959_v22 = vpack.c.bf16 %v1547_v21, %v1546_v20  ;;  %v964_v26 = vld [vmem:[%s4858_s3 + $0x60] sm:$0xff]  ;;  %v965_v27 = vld [vmem:[%s4858_s3 + $0x68] sm:$0xff] }
  0x20   : > { %3895 = vmatprep.subr.bf16.mxu0 %v4153_v3  ;;  %3870 = vmatpush3.bf16.msra.mxu1 %v3869_v34  ;;  %v3947_v16 = vpack.c.bf16 %v1259_v14, %v1258_v13  ;;  %v959_v24 = vld [vmem:[%s4858_s3 + $0x38] sm:$0xff]  ;;  %v3926_v28 = vpack.c.bf16 %v965_v27, %v964_v26  ;;  %v1252_v32 = vld [vmem:[%s4859_s4 + $0x20] sm:$0xff]  ;;  %v1253_v33 = vld [vmem:[%s4859_s4 + $0x28] sm:$0xff]  ;;  %p4099_p3 = pnand %p4098_p2, %p4092_p13 }
  0x21   : > { %3877 = vmatprep.subr.bf16.mxu1 %v4153_v3  ;;  %v967_v30 = vld [vmem:[%s4858_s3 + $0x78] sm:$0xff]  ;;  %v3938_v34 = vpack.c.bf16 %v1253_v33, %v1252_v32  ;;  %v1260_v38 = vld [vmem:[%s4859_s4 + $0x60] sm:$0xff]  ;;  %v1261_v39 = vld [vmem:[%s4859_s4 + $0x68] sm:$0xff] }
  0x22   : > { %3609 = vmatmul.mubr.msk.f32.vlgmr.msra.gmra.mrb[2].mxu0 %vm372_vm1, %v4290_v10  ;;  %v1255_v36 = vld [vmem:[%s4859_s4 + $0x38] sm:$0xff]  ;;  %v1618_v44 = vld [vmem:[%s4861_s6] sm:$0xff]  ;;  %v1619_v45 = vld [vmem:[%s4861_s6 + $0x8] sm:$0xff] }
  0x23   : > { %3897 = vmatpush3.bf16.msra.mxu0 %v3896_v23  ;;  %3630 = vmatprep.mubr.msk.f32.mxu0 %vm4154_vm0, %v4155_v6  ;;  %v958_v23 = vld [vmem:[%s4858_s3 + $0x30] sm:$0xff]  ;;  %v1263_v42 = vld [vmem:[%s4859_s4 + $0x78] sm:$0xff] }
  0x24   : > { %3898 = vmatprep.subr.bf16.mxu0 %v4153_v3  ;;  %3576 = vmatmul.mubr.msk.f32.vlgmr.msra.gmra.mrb[2].mxu1 %vm372_vm1, %v4290_v10  ;;  %v3917_v25 = vpack.c.bf16 %v959_v24, %v958_v23  ;;  %v1620_v12 = vld [vmem:[%s4861_s6 + $0x10] sm:$0xff]  ;;  %v1621_v13 = vld [vmem:[%s4861_s6 + $0x18] sm:$0xff] }
  0x25   : > { %3879 = vmatpush3.bf16.msra.mxu1 %v3878_v40  ;;  %3597 = vmatprep.mubr.msk.f32.mxu1 %vm4154_vm0, %v4155_v6  ;;  %v3950_v40 = vpack.c.bf16 %v1261_v39, %v1260_v38  ;;  %v3965_v14 = vpack.c.bf16 %v1621_v13, %v1620_v12  ;;  %v1979_v12 = vlaneseq }
  0x26   : > { %3880 = vmatprep.subr.bf16.mxu1 %v4153_v3 }
  0x27   : > { %3900 = vmatpush3.bf16.msra.mxu0 %v3899_v29  ;;  %v966_v29 = vld [vmem:[%s4858_s3 + $0x70] sm:$0xff] }
  0x28   : > { %3907 = vmatprep.subr.bf16.mxu0 %v4153_v3  ;;  %v3929_v31 = vpack.c.bf16 %v967_v30, %v966_v29  ;;  %v3381_v29 = vld [vmem:[%s4862_s7 + $0x2] ss:$0 sm:$0xff] }
  0x29   : > { %3882 = vmatpush3.bf16.msra.mxu1 %v3881_v46  ;;  %v1622_v46 = vld [vmem:[%s4861_s6 + $0x20] sm:$0xff] }
  0x2a   : > { %3631 = vmatmul.mubr.msk.f32.vlgmr.msra.gmra.mrb[4].mxu0 %vm372_vm1, %v4290_v10  ;;  %3889 = vmatprep.subr.bf16.mxu1 %v4153_v3 }
  0x2b   : > { %3909 = vmatpush3.bf16.msra.mxu0 %v3908_v35  ;;  %3652 = vmatprep.mubr.msk.f32.mxu0 %vm4154_vm0, %v4155_v6  ;;  %v1254_v35 = vld [vmem:[%s4859_s4 + $0x30] sm:$0xff] }
  0x2c   : > { %3910 = vmatprep.subr.bf16.mxu0 %v4153_v3  ;;  %3598 = vmatmul.mubr.msk.f32.vlgmr.msra.gmra.mrb[4].mxu1 %vm372_vm1, %v4290_v10  ;;  %v3941_v37 = vpack.c.bf16 %v1255_v36, %v1254_v35  ;;  %v3380_v36 = vld [vmem:[%s4862_s7 + $0x1] ss:$0 sm:$0xff] }
  0x2d   : > { %3891 = vmatpush3.bf16.msra.mxu1 %v3890_v52  ;;  %3619 = vmatprep.mubr.msk.f32.mxu1 %vm4154_vm0, %v4155_v6 }
  0x2e   : > { %3892 = vmatprep.subr.bf16.mxu1 %v4153_v3 }
  0x2f   : > { %3912 = vmatpush3.bf16.msra.mxu0 %v3911_v41  ;;  %v1262_v41 = vld [vmem:[%s4859_s4 + $0x70] sm:$0xff] }
  0x30   : > { %3919 = vmatprep.subr.bf16.mxu0 %v4153_v3  ;;  %v3953_v43 = vpack.c.bf16 %v1263_v42, %v1262_v41 }
  0x31   : > { %3894 = vmatpush3.bf16.msra.mxu1 %v3893_v58 }
  0x32   : > { %3653 = vmatmul.mubr.msk.f32.vlgmr.msra.gmra.mrb[6].mxu0 %vm372_vm1, %v4290_v10  ;;  %3901 = vmatprep.subr.bf16.mxu1 %v4153_v3 }
  0x33   : > { %3921 = vmatpush3.bf16.msra.mxu0 %v3920_v47  ;;  %3674 = vmatprep.mubr.msk.f32.mxu0 %vm4154_vm0, %v4155_v6  ;;  %v3962_v47 = vpack.c.bf16 %v1619_v45, %v1618_v44  ;;  %v3382_v44 = vld [vmem:[%s4862_s7 + $0x3] ss:$0 sm:$0xff] }
  0x34   : > { %3922 = vmatprep.subr.bf16.mxu0 %v4153_v3  ;;  %3620 = vmatmul.mubr.msk.f32.vlgmr.msra.gmra.mrb[6].mxu1 %vm372_vm1, %v4290_v10 }
  0x35   : > { %3903 = vmatpush3.bf16.msra.mxu1 %v3902_v0  ;;  %3641 = vmatprep.mubr.msk.f32.mxu1 %vm4154_vm0, %v4155_v6 }
  0x36   : > { %3904 = vmatprep.subr.bf16.mxu1 %v4153_v3 }
  0x37   : > { %3924 = vmatpush3.bf16.msra.mxu0 %v3923_v53 }
  0x38   : > { %3931 = vmatprep.subr.bf16.mxu0 %v4153_v3 }
  0x39   : > { %3906 = vmatpush3.bf16.msra.mxu1 %v3905_v8 }
  0x3a   : > { %3675 = vmatmul.mubr.msk.f32.vlgmr.msra.gmra.mrb[8].mxu0 %vm372_vm1, %v4290_v10  ;;  %3913 = vmatprep.subr.bf16.mxu1 %v4153_v3 }
  0x3b   : > { %3933 = vmatpush3.bf16.msra.mxu0 %v3932_v59  ;;  %3696 = vmatprep.mubr.msk.f32.mxu0 %vm4154_vm0, %v4155_v6 }
  0x3c   : > { %3934 = vmatprep.subr.bf16.mxu0 %v4153_v3  ;;  %3642 = vmatmul.mubr.msk.f32.vlgmr.msra.gmra.mrb[8].mxu1 %vm372_vm1, %v4290_v10 }
  0x3d   : > { %3915 = vmatpush3.bf16.msra.mxu1 %v3914_v15  ;;  %3663 = vmatprep.mubr.msk.f32.mxu1 %vm4154_vm0, %v4155_v6  ;;  %v1624_v15 = vld [vmem:[%s4861_s6 + $0x30] sm:$0xff] }
  0x3e   : > { %3916 = vmatprep.subr.bf16.mxu1 %v4153_v3 }
  0x3f   : > { %3936 = vmatpush3.bf16.msra.mxu0 %v3935_v1 }
  0x40   : > { %3943 = vmatprep.subr.bf16.mxu0 %v4153_v3 }
  0x41   : > { %3918 = vmatpush3.bf16.msra.mxu1 %v3917_v25 }
  0x42   : > { %3697 = vmatmul.mubr.msk.f32.vlgmr.msra.gmra.mrb[10].mxu0 %vm372_vm1, %v4290_v10  ;;  %3925 = vmatprep.subr.bf16.mxu1 %v4153_v3 }
  0x43   : > { %3945 = vmatpush3.bf16.msra.mxu0 %v3944_v9  ;;  %3718 = vmatprep.mubr.msk.f32.mxu0 %vm4154_vm0, %v4155_v6 }
  0x44   : > { %3946 = vmatprep.subr.bf16.mxu0 %v4153_v3  ;;  %3664 = vmatmul.mubr.msk.f32.vlgmr.msra.gmra.mrb[10].mxu1 %vm372_vm1, %v4290_v10 }
  0x45   : > { %3927 = vmatpush3.bf16.msra.mxu1 %v3926_v28  ;;  %3685 = vmatprep.mubr.msk.f32.mxu1 %vm4154_vm0, %v4155_v6  ;;  %v3379_v28 = vld [vmem:[%s4862_s7] ss:$0 sm:$0xff] }
  0x46   : > { %3928 = vmatprep.subr.bf16.mxu1 %v4153_v3 }
  0x47   : > { %3948 = vmatpush3.bf16.msra.mxu0 %v3947_v16  ;;  %v1625_v16 = vld [vmem:[%s4861_s6 + $0x38] sm:$0xff] }
  0x48   : > { %3955 = vmatprep.subr.bf16.mxu0 %v4153_v3 }
  0x49   : > { %3930 = vmatpush3.bf16.msra.mxu1 %v3929_v31 }
  0x4a   : > { %3719 = vmatmul.mubr.msk.f32.vlgmr.msra.gmra.mrb[12].mxu0 %vm372_vm1, %v4290_v10  ;;  %3937 = vmatprep.subr.bf16.mxu1 %v4153_v3 }
  0x4b   : > { %3957 = vmatpush3.bf16.msra.mxu0 %v3956_v19  ;;  %3740 = vmatprep.mubr.msk.f32.mxu0 %vm4154_vm0, %v4155_v6  ;;  %v3971_v19 = vpack.c.bf16 %v1625_v16, %v1624_v15  ;;  %v1980_v15 = vshrl.u32 %v1979_v12, 7  ;;  %v1982_v16 = vand.u32 127, %v1979_v12 }
  0x4c   : > { %3958 = vmatprep.subr.bf16.mxu0 %v4153_v3  ;;  %3686 = vmatmul.mubr.msk.f32.vlgmr.msra.gmra.mrb[12].mxu1 %vm372_vm1, %v4290_v10 }
  0x4d   : > { %3939 = vmatpush3.bf16.msra.mxu1 %v3938_v34  ;;  %3707 = vmatprep.mubr.msk.f32.mxu1 %vm4154_vm0, %v4155_v6  ;;  %vm1983_vm3 = vcmp.le.s32.totalorder %v1982_v16, %v1980_v15 }
  0x4e   : > { %3940 = vmatprep.subr.bf16.mxu1 %v4153_v3 }
  0x4f   : > { %3960 = vmatpush3.bf16.msra.mxu0 %v3959_v22 }
  0x50   : > { %3967 = vmatprep.subr.bf16.mxu0 %v4153_v3 }
  0x51   : > { %3942 = vmatpush3.bf16.msra.mxu1 %v3941_v37 }
  0x52   : > { %3741 = vmatmul.mubr.msk.f32.vlgmr.msra.gmra.mrb[14].mxu0 %vm372_vm1, %v4290_v10  ;;  %3949 = vmatprep.subr.bf16.mxu1 %v4153_v3 }
  0x53   : > { %3761 = vmatprep.mubr.msk.f32.mxu0 %vm4154_vm0, %v4155_v6 }
  0x54   : > { %3708 = vmatmul.mubr.msk.f32.vlgmr.msra.gmra.mrb[14].mxu1 %vm372_vm1, %v4290_v10 }
  0x55   : > { %3951 = vmatpush3.bf16.msra.mxu1 %v3950_v40  ;;  %3729 = vmatprep.mubr.msk.f32.mxu1 %vm4154_vm0, %v4155_v6 }
  0x56   : > { %3952 = vmatprep.subr.bf16.mxu1 %v4153_v3 }
  0x59   : > { %3954 = vmatpush3.bf16.msra.mxu1 %v3953_v43 }
  0x5a   : > { %3961 = vmatprep.subr.bf16.mxu1 %v4153_v3 }
  0x5c   : > { %3730 = vmatmul.mubr.msk.f32.vlgmr.msra.gmra.mrb[16].mxu1 %vm372_vm1, %v4290_v10  ;;  %v1623_v10 = vld [vmem:[%s4861_s6 + $0x28] sm:$0xff] }
  0x5d   : > { %3747 = vmatprep.mubr.msk.f32.mxu1 %vm4154_vm0, %v4155_v6  ;;  %v3968_v48 = vpack.c.bf16 %v1623_v10, %v1622_v46  ;;  %3963 = vmatpush3.bf16.msra.mxu1 %v3962_v47 }
  0x5e   : > { %3964 = vmatprep.subr.bf16.mxu1 %v4153_v3 }
  0x5f   : > { %3969 = vmatpush3.bf16.msra.mxu0 %v3968_v48 }
  0x60   : > { %3771 = vmatprep.subr.mxu0 %v4155_v6 }
  0xed   : > { %v4593_v49 = vpop.f32.mrb[0].mxu0  ;;  %v4597_v53 = vpop.f32.mrb[0].mxu1 }
  0xee   : > { %v3588_v50 = vpop.f32.mrb[1].mxu0  ;;  %v3566_v54 = vpop.f32.mrb[1].mxu1 }
  0xf5   : > { %v4595_v51 = vpop.f32.mrb[2].mxu0 }
  0xf6   : > { %v3610_v52 = vpop.f32.mrb[3].mxu0 }
  0xf7   : > { %v4601_v57 = vpop.f32.mrb[2].mxu1 }
  0xf8   : > { %v3577_v58 = vpop.f32.mrb[3].mxu1 }
  0xfd   : > { %v4599_v55 = vpop.f32.mrb[4].mxu0 }
  0xfe   : > { %v3632_v56 = vpop.f32.mrb[5].mxu0 }
  0xff   : > { %v4605_v61 = vpop.f32.mrb[4].mxu1 }
 0x100   : > { %v3599_v62 = vpop.f32.mrb[5].mxu1 }
 0x105   : > { %v4603_v59 = vpop.f32.mrb[6].mxu0 }
 0x106   : > { %v3654_v60 = vpop.f32.mrb[7].mxu0 }
 0x107   : > { %v4609_v1 = vpop.f32.mrb[6].mxu1 }
 0x108   : > { %v3621_v2 = vpop.f32.mrb[7].mxu1 }
 0x10d   : > { %v4607_v63 = vpop.f32.mrb[8].mxu0 }
 0x10e   : > { %v3676_v0 = vpop.f32.mrb[9].mxu0 }
 0x10f   : > { %v4613_v7 = vpop.f32.mrb[8].mxu1 }
 0x110   : > { %v3643_v8 = vpop.f32.mrb[9].mxu1 }
 0x115   : > { %v4611_v4 = vpop.f32.mrb[10].mxu0 }
 0x116   : > { %v3698_v5 = vpop.f32.mrb[11].mxu0 }
 0x117   : > { %v4643_v20 = vpop.f32.mrb[10].mxu1 }
 0x118   : > { %v3665_v21 = vpop.f32.mrb[11].mxu1 }
 0x11d   : > { %v4615_v9 = vpop.f32.mrb[12].mxu0 }
 0x11e   : > { %v3720_v11 = vpop.f32.mrb[13].mxu0 }
 0x11f   : > { %v4645_v22 = vpop.f32.mrb[12].mxu1 }
 0x120   : > { %v3687_v23 = vpop.f32.mrb[13].mxu1 }
 0x125   : > { %v1614_v17 = vpop.f32.mrb[14].mxu0 }
 0x126   : > { %v3742_v18 = vpop.f32.mrb[15].mxu0  ;;  %3748 = vmatmul.mubr.msk.f32.vlgmr.msra.gmra.mrb[18].mxu1 %vm1654_vm2, %v1614_v17  ;;  %3762 = vmatmul.mubr.msk.f32.vlgmr.msra.gmra.mrb[16].mxu0 %vm1654_vm2, %v1614_v17 }
 0x127   : > { %3966 = vmatpush3.bf16.msra.mxu1 %v3965_v14  ;;  %3754 = vmatprep.mubr.msk.f32.mxu1 %vm4154_vm0, %v4155_v6  ;;  %v4647_v24 = vpop.f32.mrb[14].mxu1 }
 0x128   : > { %3970 = vmatprep.subr.bf16.mxu1 %v4153_v3  ;;  %3773 = vmatprep.mubr.msk.f32.mxu0 %vm4154_vm0, %v4155_v6  ;;  %v3709_v25 = vpop.f32.mrb[15].mxu1 }
 0x12a   : > { %3755 = vmatmul.mubr.msk.f32.vlgmr.msra.gmra.mrb[20].mxu1 %vm1654_vm2, %v1614_v17 }
 0x12b   : > { %3972 = vmatpush3.bf16.msra.mxu1 %v3971_v19  ;;  %3768 = vmatprep.mubr.msk.f32.mxu1 %vm4154_vm0, %v4155_v6 }
 0x12c   : > { %3776 = vmatprep.subr.mxu1 %v4155_v6 }
 0x12e   : > { %3769 = vmatmul.mubr.msk.f32.vlgmr.msra.gmra.mrb[22].mxu1 %vm1654_vm2, %v1614_v17 }
 0x12f   : > { %3778 = vmatprep.mubr.msk.f32.mxu1 %vm4154_vm0, %v4155_v6  ;;  %v4649_v26 = vpop.f32.mrb[16].mxu1 }
 0x130   : > { %v3731_v27 = vpop.f32.mrb[17].mxu1 }
 0x1f9   : > { %v1724_v30 = vpop.f32.mrb[18].mxu1  ;;  %v1864_v31 = vpop.f32.mrb[16].mxu0 }
 0x1fa   : > { %v1725_v32 = vadd.f32 %v3379_v28, %v1724_v30  ;;  %v1865_v33 = vadd.f32 %v3381_v29, %v1864_v31  ;;  %v3749_v34 = vpop.f32.mrb[19].mxu1  ;;  %v3763_v35 = vpop.f32.mrb[17].mxu0  ;;  %v4664_v31 = vsel %vm1983_vm3, 1.0, %v4155_v6 }
 0x1fc   : > { %v1942_v37 = vand.u32 2147483647, %v1725_v32  ;;  %v1944_v38 = vand.u32 2147483647, %v1865_v33  ;;  %v1938_v19 = vmin.f32 %v1725_v32, 0.0  ;;  %v1940_v23 = vmin.f32 %v1865_v33, 0.0 }
 0x1fd   : > { %v1794_v39 = vpop.f32.mrb[20].mxu1 }
 0x1fe   : > { %v1946_v40 = vsub.f32 0.0, %v1942_v37  ;;  %v1948_v41 = vsub.f32 0.0, %v1944_v38  ;;  %v1795_v42 = vadd.f32 %v3380_v36, %v1794_v39  ;;  %v3756_v43 = vpop.f32.mrb[21].mxu1 }
 0x200   : > { %v1950_v45 = vmul.f32 1.442695, %v1946_v40  ;;  %v1954_v46 = vmul.f32 1.442695, %v1948_v41  ;;  %v1943_v47 = vand.u32 2147483647, %v1795_v42 }
 0x201   : > { %v1934_v10 = vpop.f32.mrb[22].mxu1  ;;  %v1939_v34 = vmin.f32 %v1795_v42, 0.0 }
 0x202   : > { %4033 = vpow2.f32 %v1950_v45  ;;  %v1935_v48 = vadd.f32 %v3382_v44, %v1934_v10  ;;  %v3770_v50 = vpop.f32.mrb[23].mxu1  ;;  %v1947_v52 = vsub.f32 0.0, %v1943_v47 }
 0x203   : > { %4035 = vpow2.f32 %v1954_v46 }
 0x204   : > { %v1945_v54 = vand.u32 2147483647, %v1935_v48  ;;  %v1952_v56 = vmul.f32 1.442695, %v1947_v52  ;;  %v1941_v32 = vmin.f32 %v1935_v48, 0.0 }
 0x206   : > { %v1949_v58 = vsub.f32 0.0, %v1945_v54  ;;  %4037 = vpow2.f32 %v1952_v56 }
 0x208   : > { %v1956_v60 = vmul.f32 1.442695, %v1949_v58 }
 0x20a   : > { %4039 = vpow2.f32 %v1956_v60 }
 0x20c   : > { %v4034_v62 = vpop.eup %4033 }
 0x20d   : > { %v4036_v0 = vpop.eup %4035  ;;  %v1958_v2 = vadd.f32 1.0, %v4034_v62 }
 0x20e   : > { %v1960_v5 = vadd.f32 1.0, %v4036_v0 }
 0x20f   : > { %4041 = vlog2.f32 %v1958_v2 }
 0x210   : > { %4043 = vlog2.f32 %v1960_v5  ;;  %v4038_v8 = vpop.eup %4037 }
 0x211   : > { %v1959_v11 = vadd.f32 1.0, %v4038_v8 }
 0x213   : > { %4045 = vlog2.f32 %v1959_v11 }
 0x214   : > { %v4040_v13 = vpop.eup %4039 }
 0x215   : > { %v1961_v14 = vadd.f32 1.0, %v4040_v13 }
 0x217   : > { %4047 = vlog2.f32 %v1961_v14 }
 0x219   : > { %v4042_v17 = vpop.eup %4041 }
 0x21a   : > { %v4044_v18 = vpop.eup %4043  ;;  %v1963_v21 = vmul.f32 0.6931472, %v4042_v17 }
 0x21b   : > { %v1967_v25 = vmul.f32 0.6931472, %v4044_v18 }
 0x21c   : > { %v1970_v27 = vsub.f32 %v1938_v19, %v1963_v21 }
 0x21d   : > { %v1972_v28 = vsub.f32 %v1940_v23, %v1967_v25  ;;  %v4046_v29 = vpop.eup %4045 }
 0x21e   : > { %v1975_v30 = vmul.f32 0.0625, %v1970_v27  ;;  %v1965_v35 = vmul.f32 0.6931472, %v4046_v29 }
 0x21f   : > { %v1977_v36 = vmul.f32 0.0625, %v1972_v28 }
 0x220   : > { %3772 = vmatpush3.msra.mxu0 %v1975_v30  ;;  %v1971_v38 = vsub.f32 %v1939_v34, %v1965_v35 }
 0x221   : > { %v4048_v37 = vpop.eup %4047  ;;  %3774 = vmatmul.mubr.msk.f32.vlgmr.msra.gmra.mrb[18].mxu0 %vm1987_vm4, %v4664_v31  ;;  %3781 = vmatprep.subr.mxu0 %v4155_v6 }
 0x222   : > { %v1969_v33 = vmul.f32 0.6931472, %v4048_v37  ;;  %3782 = vmatpush3.msra.mxu0 %v1977_v36  ;;  %3783 = vmatprep.mubr.msk.f32.mxu0 %vm4154_vm0, %v4155_v6  ;;  %v1976_v39 = vmul.f32 0.0625, %v1971_v38 }
 0x223   : > { %3791 = vmatprep.subr.mxu0 %v4155_v6 }
 0x224   : > { %v1973_v40 = vsub.f32 %v1941_v32, %v1969_v33  ;;  %3777 = vmatpush3.msra.mxu1 %v1976_v39 }
 0x225   : > { %3784 = vmatmul.mubr.msk.f32.vlgmr.msra.gmra.mrb[20].mxu0 %vm1987_vm4, %v4664_v31  ;;  %3779 = vmatmul.mubr.msk.f32.vlgmr.msra.gmra.mrb[24].mxu1 %vm1987_vm4, %v4664_v31 }
 0x226   : > { %v1978_v41 = vmul.f32 0.0625, %v1973_v40  ;;  %3786 = vmatprep.subr.mxu1 %v4155_v6  ;;  %3788 = vmatprep.mubr.msk.f32.mxu1 %vm4154_vm0, %v4155_v6 }
 0x227   : > { %3793 = vmatprep.mubr.msk.f32.mxu0 %vm4154_vm0, %v4155_v6 }
 0x228   : > { %3787 = vmatpush3.msra.mxu1 %v1978_v41 }
 0x229   : > { %3796 = vmatprep.subr.mxu1 %v4155_v6  ;;  %3789 = vmatmul.mubr.msk.f32.vlgmr.msra.gmra.mrb[26].mxu1 %vm1987_vm4, %v4664_v31 }
 0x22a   : > { %3798 = vmatprep.mubr.msk.f32.mxu1 %vm4154_vm0, %v4155_v6 }
 0x2f4   : > { %v2057_v42 = vpop.f32.mrb[18].mxu0 }
 0x2f5   : > { %v2271_v43 = vmul.f32 1.442695, %v2057_v42  ;;  %v2287_v44 = vsub.f32 0.0, %v2057_v42  ;;  %v3775_v45 = vpop.f32.mrb[19].mxu0 }
 0x2f7   : > { %4049 = vpow2.f32 %v2271_v43  ;;  %v2291_v46 = vmul.f32 1.442695, %v2287_v44 }
 0x2f8   : > { %v2197_v47 = vpop.f32.mrb[20].mxu0  ;;  %v2127_v10 = vpop.f32.mrb[24].mxu1 }
 0x2f9   : > { %4051 = vpow2.f32 %v2291_v46  ;;  %v2275_v48 = vmul.f32 1.442695, %v2197_v47  ;;  %v2289_v50 = vsub.f32 0.0, %v2197_v47  ;;  %v3785_v52 = vpop.f32.mrb[21].mxu0  ;;  %v2273_v54 = vmul.f32 1.442695, %v2127_v10 }
 0x2fa   : > { %v2288_v56 = vsub.f32 0.0, %v2127_v10  ;;  %v3780_v58 = vpop.f32.mrb[25].mxu1 }
 0x2fb   : > { %4053 = vpow2.f32 %v2275_v48  ;;  %v2295_v60 = vmul.f32 1.442695, %v2289_v50 }
 0x2fc   : > { %4055 = vpow2.f32 %v2273_v54  ;;  %v2293_v62 = vmul.f32 1.442695, %v2288_v56  ;;  %v2267_v0 = vpop.f32.mrb[26].mxu1  ;;  %v3409_v54 = vld [vmem:[%s4863_s8 + $0x10] sm:$0xff]  ;;  %v3410_v56 = vld [vmem:[%s4863_s8 + $0x18] sm:$0xff] }
 0x2fd   : > { %4057 = vpow2.f32 %v2295_v60  ;;  %v2277_v2 = vmul.f32 1.442695, %v2267_v0  ;;  %v2290_v5 = vsub.f32 0.0, %v2267_v0  ;;  %v3790_v8 = vpop.f32.mrb[27].mxu1  ;;  %v3974_v58 = vpack.c.bf16 %v3410_v56, %v3409_v54 }
 0x2fe   : > { %4059 = vpow2.f32 %v2293_v62  ;;  %v3407_v60 = vmul.f32 -1.442695, %v4615_v9  ;;  %v3406_v62 = vmul.f32 -1.442695, %v4647_v24  ;;  %v3405_v0 = vmul.f32 -1.442695, %v4611_v4 }
 0x2ff   : > { %4061 = vpow2.f32 %v2277_v2  ;;  %v2297_v11 = vmul.f32 1.442695, %v2290_v5  ;;  %v3408_v2 = vmul.f32 -1.442695, %v4649_v26 }
 0x301   : > { %v4050_v12 = vpop.eup %4049  ;;  %4063 = vpow2.f32 %v2297_v11 }
 0x302   : > { %v2279_v13 = vmul.f32 %v4050_v12, %v4597_v53  ;;  %4065 = vpow2.f32 %v3407_v60 }
 0x303   : > { %v4052_v14 = vpop.eup %4051  ;;  %4067 = vpow2.f32 %v3406_v62 }
 0x304   : > { %v2299_v15 = vmul.f32 %v4052_v14, %v4595_v51  ;;  %v2283_v21 = vmul.f32 0.35355338, %v2279_v13  ;;  %4069 = vpow2.f32 %v3405_v0 }
 0x305   : > { %v4054_v16 = vpop.eup %4053  ;;  %4071 = vpow2.f32 %v3408_v2 }
 0x306   : > { %v4056_v17 = vpop.eup %4055  ;;  %3792 = vmatpush3.xpose.msk.msra.mxu0 %vm1987_vm4, %v2299_v15  ;;  %v2281_v18 = vmul.f32 %v4054_v16, %v4593_v49 }
 0x307   : > { %v4058_v19 = vpop.eup %4057  ;;  %3801 = vmatprep.subr.mxu0 %v4155_v6  ;;  %v2280_v23 = vmul.f32 %v4056_v17, %v4601_v57 }
 0x308   : > { %v4060_v25 = vpop.eup %4059  ;;  %v2301_v27 = vmul.f32 %v4058_v19, %v4599_v55  ;;  %v2285_v49 = vmul.f32 0.35355338, %v2281_v18 }
 0x309   : > { %3794 = vmatmul.mubr.msk.f32.vlgmr.msra.gmra.mrb[22].mxu0 %vm1987_vm4, %v2283_v21  ;;  %v2300_v53 = vmul.f32 %v4060_v25, %v4609_v1  ;;  %v4062_v51 = vpop.eup %4061  ;;  %v2284_v29 = vmul.f32 0.35355338, %v2280_v23 }
 0x30a   : > { %3802 = vmatpush3.xpose.msk.msra.mxu0 %vm1987_vm4, %v2301_v27  ;;  %3803 = vmatprep.mubr.msk.f32.mxu0 %vm4154_vm0, %v4155_v6  ;;  %v2282_v57 = vmul.f32 %v4062_v51, %v4605_v61 }
 0x30b   : > { %3797 = vmatpush3.xpose.msk.msra.mxu1 %vm1987_vm4, %v2300_v53  ;;  %3811 = vmatprep.subr.mxu0 %v4155_v6  ;;  %v4064_v28 = vpop.eup %4063 }
 0x30c   : > { %3806 = vmatprep.subr.mxu1 %v4155_v6  ;;  %v2302_v55 = vmul.f32 %v4064_v28, %v4613_v7  ;;  %v2286_v1 = vmul.f32 0.35355338, %v2282_v57  ;;  %v4066_v5 = vpop.eup %4065 }
 0x30d   : > { %3804 = vmatmul.mubr.msk.f32.vlgmr.msra.gmra.mrb[24].mxu0 %vm1987_vm4, %v2285_v49  ;;  %v4068_v8 = vpop.eup %4067  ;;  %v2959_v11 = vadd.f32 1.0, %v4066_v5 }
 0x30e   : > { %3799 = vmatmul.mubr.msk.f32.vlgmr.msra.gmra.mrb[28].mxu1 %vm1987_vm4, %v2284_v29  ;;  %3812 = vmatpush3.msra.mxu0 %v4603_v59  ;;  %v2958_v12 = vadd.f32 1.0, %v4068_v8  ;;  %v4070_v14 = vpop.eup %4069 }
 0x30f   : > { %3807 = vmatpush3.xpose.msk.msra.mxu1 %vm1987_vm4, %v2302_v55  ;;  %3808 = vmatprep.mubr.msk.f32.mxu1 %vm4154_vm0, %v4155_v6  ;;  %v4072_v17 = vpop.eup %4071  ;;  %4073 = vrcp.f32 %v2959_v11  ;;  %v2957_v21 = vadd.f32 1.0, %v4070_v14 }
 0x310   : > { %3816 = vmatprep.subr.mxu1 %v4155_v6  ;;  %3813 = vmatprep.mubr.msk.f32.mxu0 %vm4154_vm0, %v4155_v6  ;;  %4075 = vrcp.f32 %v2958_v12  ;;  %v2960_v25 = vadd.f32 1.0, %v4072_v17 }
 0x311   : > { %3821 = vmatprep.subr.mxu0 %v4155_v6 }
 0x312   : > { %3809 = vmatmul.mubr.msk.f32.vlgmr.msra.gmra.mrb[30].mxu1 %vm1987_vm4, %v2286_v1 }
 0x313   : > { %3817 = vmatpush3.msra.mxu1 %v4643_v20  ;;  %3818 = vmatprep.mubr.msk.f32.mxu1 %vm4154_vm0, %v4155_v6 }
 0x314   : > { %3826 = vmatprep.subr.mxu1 %v4155_v6 }
 0x319   : > { %v4074_v29 = vpop.eup %4073 }
 0x31a   : > { %v4076_v55 = vpop.eup %4075 }
 0x3dc   : > { %v2375_v59 = vpop.f32.mrb[22].mxu0 }
 0x3dd   : > { %v2607_v61 = vmul.f32 %v4664_v31, %v2375_v59  ;;  %v3795_v7 = vpop.f32.mrb[23].mxu0  ;;  %v3404_v59 = vld [vmem:[%s4864_s9] ss:$0 sm:$0xff] }
 0x3df   : > { %3814 = vmatmul.mubr.msk.f32.vlgmr.msra.gmra.mrb[26].mxu0 %vm1987_vm4, %v2607_v61 }
 0x3e0   : > { %3822 = vmatpush3.msra.mxu0 %v4607_v63  ;;  %v2527_v30 = vpop.f32.mrb[24].mxu0  ;;  %3823 = vmatprep.mubr.msk.f32.mxu0 %vm4154_vm0, %v4155_v6 }
 0x3e1   : > { %v2451_v34 = vpop.f32.mrb[28].mxu1  ;;  %v2609_v20 = vmul.f32 %v4664_v31, %v2527_v30  ;;  %v3805_v35 = vpop.f32.mrb[25].mxu0  ;;  %3973 = vmatprep.subr.bf16.mxu0 %v4153_v3 }
 0x3e2   : > { %v2608_v36 = vmul.f32 %v4664_v31, %v2451_v34  ;;  %v3800_v37 = vpop.f32.mrb[29].mxu1  ;;  %v2977_v34 = vld [vmem:[%s4863_s8] sm:$0xff] }
 0x3e3   : > { %3824 = vmatmul.mubr.msk.f32.vlgmr.msra.gmra.mrb[28].mxu0 %vm1987_vm4, %v2609_v20  ;;  %v2978_v20 = vld [vmem:[%s4863_s8 + $0x8] sm:$0xff] }
 0x3e4   : > { %3819 = vmatmul.mubr.msk.f32.vlgmr.msra.gmra.mrb[32].mxu1 %vm1987_vm4, %v2608_v36  ;;  %3835 = vmatprep.mubr.msk.f32.mxu0 %vm4154_vm0, %v4155_v6  ;;  %v2971_v36 = vmul.f32 %v4074_v29, %v4615_v9 }
 0x3e5   : > { %3827 = vmatpush3.msra.mxu1 %v4645_v22  ;;  %v2603_v63 = vpop.f32.mrb[30].mxu1  ;;  %3828 = vmatprep.mubr.msk.f32.mxu1 %vm4154_vm0, %v4155_v6 }
 0x3e6   : > { %v2610_v38 = vmul.f32 %v4664_v31, %v2603_v63  ;;  %v3810_v32 = vpop.f32.mrb[31].mxu1  ;;  %3975 = vmatpush3.bf16.msra.mxu0 %v3974_v58 }
 0x3e7   : > { %3976 = vmatprep.subr.bf16.mxu0 %v4153_v3 }
 0x3e8   : > { %3829 = vmatmul.mubr.msk.f32.vlgmr.msra.gmra.mrb[34].mxu1 %vm1987_vm4, %v2610_v38  ;;  %v2970_v38 = vmul.f32 %v4076_v55, %v4647_v24 }
 0x4b2   : > { %v4735_v33 = vpop.f32.mrb[26].mxu0 }
 0x4b3   : > { %v3815_v39 = vpop.f32.mrb[27].mxu0  ;;  %v2903_v45 = vmul.f32 %v4735_v33, %v4735_v33 }
 0x4b5   : > { %v2907_v50 = vsel %vm1654_vm2, %v2903_v45, 0.0 }
 0x4b6   : > { %v4737_v40 = vpop.f32.mrb[28].mxu0 }
 0x4b7   : > { %v4739_v41 = vpop.f32.mrb[32].mxu1  ;;  %v3825_v42 = vpop.f32.mrb[29].mxu0  ;;  %v2905_v22 = vmul.f32 %v4737_v40, %v4737_v40 }
 0x4b8   : > { %v3820_v43 = vpop.f32.mrb[33].mxu1  ;;  %v2904_v44 = vmul.f32 %v4739_v41, %v4739_v41 }
 0x4b9   : > { %v2913_v31 = vsel %vm1654_vm2, %v2905_v22, 0.0 }
 0x4ba   : > { %2914 = vadd.xlane.f32.xlu1 %v2913_v31  ;;  %v2910_v46 = vsel %vm1654_vm2, %v2904_v44, 0.0 }
 0x4bb   : > { %2911 = vadd.xlane.f32.xlu0 %v2910_v46  ;;  %v4749_v47 = vpop.f32.mrb[34].mxu1 }
 0x4bc   : > { %v2906_v10 = vmul.f32 %v4749_v47, %v4749_v47  ;;  %v3830_v48 = vpop.f32.mrb[35].mxu1 }
 0x4bd   : > { %v3417_v48 = vld [vmem:[%s4863_s8 + $0x38] sm:$0xff] }
 0x4be   : > { %v2916_v52 = vsel %vm1654_vm2, %v2906_v10, 0.0  ;;  %v3416_v10 = vld [vmem:[%s4863_s8 + $0x30] sm:$0xff] }
 0x4bf   : > { %2908 = vadd.xlane.f32.xlu0 %v2907_v50  ;;  %2917 = vadd.xlane.f32.xlu1 %v2916_v52  ;;  %v3983_v50 = vpack.c.bf16 %v3417_v48, %v3416_v10 }
 0x547   : > { %v2915_v13 = vpop.xlane.xlu1 %2914 }
 0x548   : > { %v2921_v15 = vmul.f32 0.0625, %v2915_v13  ;;  %v2912_v16 = vpop.xlane.xlu0 %2911 }
 0x549   : > { %v2920_v18 = vmul.f32 0.0625, %v2912_v16 }
 0x54a   : > { %v2925_v19 = vadd.f32 1e-05, %v2921_v15 }
 0x54b   : > { %v2924_v23 = vadd.f32 1e-05, %v2920_v18 }
 0x54c   : > { %4077 = vrsqrt.f32 %v2925_v19  ;;  %v2909_v27 = vpop.xlane.xlu0 %2908  ;;  %v2918_v53 = vpop.xlane.xlu1 %2917 }
 0x54d   : > { %4079 = vrsqrt.f32 %v2924_v23  ;;  %v2919_v51 = vmul.f32 0.0625, %v2909_v27  ;;  %v2922_v49 = vmul.f32 0.0625, %v2918_v53 }
 0x54e   : > { %4081 = vrcp.f32 %v2957_v21 }
 0x54f   : > { %v2923_v57 = vadd.f32 1e-05, %v2919_v51  ;;  %v2926_v28 = vadd.f32 1e-05, %v2922_v49  ;;  %4083 = vrcp.f32 %v2960_v25 }
 0x551   : > { %4085 = vrsqrt.f32 %v2923_v57 }
 0x552   : > { %4087 = vrsqrt.f32 %v2926_v28 }
 0x556   : > { %v4078_v1 = vpop.eup %4077 }
 0x557   : > { %v4080_v61 = vpop.eup %4079  ;;  %v2933_v7 = vmul.f32 %v4078_v1, %v4737_v40  ;;  %v3977_v40 = vpack.c.bf16 %v2978_v20, %v2977_v34 }
 0x558   : > { %v2932_v30 = vmul.f32 %v4080_v61, %v4739_v41  ;;  %v4082_v35 = vpop.eup %4081 }
 0x559   : > { %v2943_v37 = vmul.f32 %v3404_v59, %v2933_v7  ;;  %v4084_v63 = vpop.eup %4083  ;;  %v2969_v31 = vmul.f32 %v4082_v35, %v4611_v4  ;;  %v3414_v4 = vld [vmem:[%s4863_s8 + $0x28] sm:$0xff] }
 0x55a   : > { %v2942_v32 = vmul.f32 %v3404_v59, %v2932_v30  ;;  %v2972_v9 = vmul.f32 %v4084_v63, %v4649_v26 }
 0x55b   : > { %v4086_v39 = vpop.eup %4085  ;;  %v2975_v42 = vmul.f32 %v2971_v36, %v2943_v37 }
 0x55c   : > { %v4088_v41 = vpop.eup %4087  ;;  %v2931_v22 = vmul.f32 %v4086_v39, %v4735_v33  ;;  %v2974_v43 = vmul.f32 %v2970_v38, %v2942_v32  ;;  %v3413_v33 = vld [vmem:[%s4863_s8 + $0x20] sm:$0xff] }
 0x55d   : > { %v2934_v44 = vmul.f32 %v4088_v41, %v4749_v47  ;;  %v3980_v26 = vpack.c.bf16 %v3414_v4, %v3413_v33 }
 0x55e   : > { %v2941_v45 = vmul.f32 %v3404_v59, %v2931_v22  ;;  %3836 = vmatmul.mubr.msk.f32.vlgmr.msra.gmra.mrb[30].mxu0 %vm1654_vm2, %v2974_v43 }
 0x55f   : > { %v2944_v46 = vmul.f32 %v3404_v59, %v2934_v44  ;;  %3978 = vmatpush3.bf16.msra.mxu0 %v3977_v40  ;;  %3842 = vmatprep.mubr.msk.f32.mxu0 %vm4154_vm0, %v4155_v6 }
 0x560   : > { %v2973_v24 = vmul.f32 %v2969_v31, %v2941_v45  ;;  %3979 = vmatprep.subr.bf16.mxu0 %v4153_v3 }
 0x561   : > { %v2976_v47 = vmul.f32 %v2972_v9, %v2944_v46 }
 0x566   : > { %3843 = vmatmul.mubr.msk.f32.vlgmr.msra.gmra.mrb[30].mxu0 %vm1654_vm2, %v2973_v24 }
 0x567   : > { %3981 = vmatpush3.bf16.msra.mxu0 %v3980_v26  ;;  %3849 = vmatprep.mubr.msk.f32.mxu0 %vm4154_vm0, %v4155_v6 }
 0x568   : > { %3982 = vmatprep.subr.bf16.mxu0 %v4153_v3 }
 0x56e   : > { %3850 = vmatmul.mubr.msk.f32.vlgmr.msra.gmra.mrb[30].mxu0 %vm1654_vm2, %v2975_v42 }
 0x56f   : > { %3984 = vmatpush3.bf16.msra.mxu0 %v3983_v50  ;;  %3856 = vmatprep.mubr.msk.f32.mxu0 %vm4154_vm0, %v4155_v6 }
 0x576   : > { %3857 = vmatmul.mubr.msk.f32.vlgmr.msra.gmra.mrb[30].mxu0 %vm1654_vm2, %v2976_v47 }
 0x649   : > { %v3277_v3 = vpop.f32.mrb[30].mxu0 }
 0x64a   : > { %3282 = vst.msk [vmem:[%s350_s18] sm:$0xff] %vm372_vm1, %v3277_v3  ;;  %v3858_v6 = vpop.f32.mrb[31].mxu0 }
 0x64b   : > { %4102 = shalt.err (!%p4099_p3)
}
 0x64c   : > { %s4103_s12 = scalar_lea.hbm %s4812_s28, 128  ;;  %s4107_s26 = scalar_lea.hbm %s4865_s10, 256 }
 0x64d   : > { %p4104_p4 = scmp.ne.s32.totalorder %s4812_s28, %s4103_s12  ;;  %p4108_p9 = scmp.lt.u32.totalorder %s4812_s28, %s4865_s10 }
 0x64e   : > { %p4109_p10 = scmp.lt.u32.totalorder %s4107_s26, %s4103_s12  ;;  %p4111_p12 = scmp.lt.u32.totalorder %s4103_s12, %s4812_s28 }
 0x64f   : > { %p4105_p7 = pnand %p4104_p4, %p4250_p5 }
 0x650   : > { %p4110_p11 = por %p4109_p10, %p4108_p9 }
 0x651   : > { %p4106_p8 = pneg %p4105_p7 }
 0x652   : > { %p4112_p13 = por %p4111_p12, %p4110_p11 }
 0x654   : > { %p4113_p0 = pnand %p4112_p13, %p4106_p8 }
 0x656   : > { %4116 = shalt.err (!%p4113_p0)
}
 0x657   : > { %3991 = dma.vmem_to_hbm [thread:$0]  (%p4250_p5), %s4814_s25, 128, %s4812_s28, %s3284_s29  }
 0x658 PF: > { %p3997_p1 = scmp.ge.s32.totalorder %s4151_s16, 2  ;;  %s3309_s30 = sand.u32 1, %s4139_s13  }
 0x659   : > { %s3310_s11 = scalar_lea.sflag [#allocation3], %s3309_s30 }
 0x65a   : > { %p3994_p2 = pnand %p3997_p1, %p4254_p6 }
 0x65c   : > { %4134 = dma.done.wait (!%p3994_p2), %s3310_s11, 128  }
 0x65d   : > { %4136 = vsyncadd (!%p3994_p2), %s3310_s11, 4294967168  ;;  %p20_p3 = scmp.ge.s32.totalorder %s4237_s19, 4   ;;  %s4868_s13 = smov %s4143_s14 }
 0x65e   : > { %s4869_s14 = smov %s4147_s15  ;;  %s4870_s15 = smov %s4248_s22 }
 0x65f   : > { %s4871_s16 = smov %s4237_s19  ;;  %22 = sbr.rel (!%p20_p3) target bundleno = 3 (0x3), region = 98 }
 0x666   :  { %3315 = vsyncpa [#allocation3], 1 }
 0x667   :  { %3317 = vsyncpa [#allocation3 + $0x1], 1 }

</bundles_post_ra>
